<compile_context>
chip_gen: v7x
topology: tpu7x:2x2x1
jax: 0.10.0
libtpu: 0.0.40
codegen_flags: <defaults>
</compile_context>

<pallas_src>
import math
import itertools

import numpy as np
import jax
import jax.numpy as jnp
from jax.experimental import pallas as pl
from jax.experimental.pallas import tpu as pltpu

# ----------------------- deterministic parameters ---------------------------

Y_TABLE = np.array(
    [[16, 11, 10, 16, 24, 40, 51, 61],
     [12, 12, 14, 19, 26, 58, 60, 55],
     [14, 13, 16, 24, 40, 57, 69, 56],
     [14, 17, 22, 29, 51, 87, 80, 62],
     [18, 22, 37, 56, 68, 109, 103, 77],
     [24, 35, 55, 64, 81, 104, 113, 92],
     [49, 64, 78, 87, 103, 121, 120, 101],
     [72, 92, 95, 98, 112, 100, 103, 99]], dtype=np.float32).T

# TODO(synk): the reference builds c_table from np.empty (uninitialized memory);
# we use the canonical DiffJPEG chroma table deterministically instead.
C_TABLE = np.full((8, 8), 99.0, dtype=np.float32)
C_TABLE[:4, :4] = np.array(
    [[17, 18, 24, 47],
     [18, 21, 26, 66],
     [24, 26, 56, 99],
     [47, 66, 99, 99]], dtype=np.float32).T

# 8-point DCT basis: C8[u, x] = cos((2x+1) u pi / 16)
C8 = np.array([[math.cos((2 * x + 1) * u * math.pi / 16) for x in range(8)]
               for u in range(8)], dtype=np.float32)
_ALPHA = np.array([1.0 / math.sqrt(2)] + [1.0] * 7, dtype=np.float32)
SCALE8 = (np.outer(_ALPHA, _ALPHA) * 0.25).astype(np.float32)   # fwd-DCT scale
ALPHA8 = np.outer(_ALPHA, _ALPHA).astype(np.float32)            # IDCT pre-scale


def quality_to_factor(quality):
    if quality < 50:
        q = 5000.0 / quality
    else:
        q = 200.0 - quality * 2
    return q / 100.0


# --------------------------- host-side helpers -------------------------------

def _pick(dim, target, quantum):
    """Largest multiple of `quantum` that divides `dim` and is <= target.
    Falls back to the full extent (which always satisfies the BlockSpec rule)."""
    t = min(int(target), int(dim))
    t -= t % quantum
    while t >= quantum:
        if dim % t == 0:
            return t
        t -= quantum
    return int(dim)


def _blockdiag_c8(n):
    """(n, n) block-diagonal matrix with n//8 copies of C8 on the diagonal."""
    m = np.zeros((n, n), dtype=np.float32)
    for k in range(n // 8):
        m[8 * k:8 * k + 8, 8 * k:8 * k + 8] = C8
    return m


def _pool_mats(th, tw):
    """2x2 average pooling as (th/2, th) @ x @ (tw, tw/2) with 0.5 entries."""
    ah = np.zeros((th // 2, th), np.float32)
    ah[np.arange(th // 2), 2 * np.arange(th // 2)] = 0.5
    ah[np.arange(th // 2), 2 * np.arange(th // 2) + 1] = 0.5
    aw = np.zeros((tw, tw // 2), np.float32)
    aw[2 * np.arange(tw // 2), np.arange(tw // 2)] = 0.5
    aw[2 * np.arange(tw // 2) + 1, np.arange(tw // 2)] = 0.5
    return ah, aw


def _upsample_mats(th, tw):
    """Nearest 2x upsample as (th, th/2) @ x @ (tw/2, tw) with 0/1 entries."""
    uh = np.zeros((th, th // 2), np.float32)
    uh[np.arange(th), np.arange(th) // 2] = 1.0
    uw = np.zeros((tw // 2, tw), np.float32)
    uw[np.arange(tw) // 2, np.arange(tw)] = 1.0
    return uh, uw


def _cparams(n_axes):
    # Tiles are sized so in/out double-buffers + constants stay well under the
    # 32 MiB default scoped VMEM (and v7x's 64 MiB physical VMEM).
    return pltpu.CompilerParams(
        dimension_semantics=("parallel",) * n_axes,
        vmem_limit_bytes=32 * 1024 * 1024)


# ----------------------------- Pallas kernels --------------------------------

def _compress_color_kernel(x_ref, ah_ref, aw_ref, y_ref, c_ref):
    # x_ref: (1, 3, TH, TW); ah: (TH/2, TH); aw: (TW, TW/2)
    # y_ref: (1, TH, TW);    c_ref: (1, 2, TH/2, TW/2)  [0]=Cb, [1]=Cr
    r = x_ref[0, 0]
    g = x_ref[0, 1]
    b = x_ref[0, 2]
    y_ref[0, :, :] = 0.299 * r + 0.587 * g + 0.114 * b
    cb = -0.168736 * r - 0.331264 * g + 0.5 * b + 128.0
    cr = 0.5 * r - 0.418688 * g - 0.081312 * b + 128.0
    ah = ah_ref[...]
    aw = aw_ref[...]
    # fused 2x2 average pool (MXU matmuls; XLU/MXU work is free next to the
    # HBM-bound elementwise path)
    c_ref[0, 0, :, :] = jnp.dot(
        jnp.dot(ah, cb, preferred_element_type=jnp.float32), aw,
        preferred_element_type=jnp.float32)
    c_ref[0, 1, :, :] = jnp.dot(
        jnp.dot(ah, cr, preferred_element_type=jnp.float32), aw,
        preferred_element_type=jnp.float32)


def _jpeg_core_kernel(x_ref, ldct_ref, rdct_ref, lidct_ref, ridct_ref,
                      sc_ref, al_ref, q_ref, o_ref):
    # Per-tile separable 8x8 DCT -> quantize -> dequantize -> inverse DCT,
    # operating on the natural (TH, TW) plane layout via block-diagonal DCT
    # matrices (no 8x8 block split/merge needed anywhere).
    x = x_ref[0] - 128.0
    d = jnp.dot(ldct_ref[...], x, preferred_element_type=jnp.float32)
    d = jnp.dot(d, rdct_ref[...], preferred_element_type=jnp.float32)
    d = d * sc_ref[...]
    q = q_ref[...]
    # diff_round forward value == round (half-to-even); keep the divide (not a
    # reciprocal multiply) so exact-half quantization boundaries match the module.
    coef = jnp.round(d / q)
    deq = (coef * q) * al_ref[...]
    rec = jnp.dot(lidct_ref[...], deq, preferred_element_type=jnp.float32)
    rec = jnp.dot(rec, ridct_ref[...], preferred_element_type=jnp.float32)
    o_ref[0, :, :] = 0.25 * rec + 128.0


def _decompress_color_kernel(y_ref, c_ref, uh_ref, uw_ref, o_ref):
    # y_ref: (1, TH, TW); c_ref: (1, 2, TH/2, TW/2); o_ref: (1, 3, TH, TW)
    y = y_ref[0]
    uh = uh_ref[...]
    uw = uw_ref[...]
    cb = jnp.dot(jnp.dot(uh, c_ref[0, 0], preferred_element_type=jnp.float32),
                 uw, preferred_element_type=jnp.float32) - 128.0
    cr = jnp.dot(jnp.dot(uh, c_ref[0, 1], preferred_element_type=jnp.float32),
                 uw, preferred_element_type=jnp.float32) - 128.0
    r = y + 1.402 * cr
    g = y - 0.344136 * cb - 0.714136 * cr
    b = y + 1.772 * cb
    o_ref[0, 0, :, :] = jnp.clip(r, 0.0, 255.0)
    o_ref[0, 1, :, :] = jnp.clip(g, 0.0, 255.0)
    o_ref[0, 2, :, :] = jnp.clip(b, 0.0, 255.0)


# ------------------------------ wrappers --------------------------------------

def compress_color(x, *, row_target=128, col_target=512):
    """RGB (B,3,H,W) -> Y (B,H,W) and stacked pooled chroma (B,2,H/2,W/2)."""
    B, _, H, W = x.shape
    th = _pick(H, row_target, 16)      # even & mult of 8 so chroma tile is 8-aligned
    tw = _pick(W, col_target, 256)     # tw/2 stays a multiple of 128 (or full W)
    ah, aw = _pool_mats(th, tw)
    return pl.pallas_call(
        _compress_color_kernel,
        out_shape=(jax.ShapeDtypeStruct((B, H, W), jnp.float32),
                   jax.ShapeDtypeStruct((B, 2, H // 2, W // 2), jnp.float32)),
        grid=(B, H // th, W // tw),
        in_specs=[
            pl.BlockSpec((1, 3, th, tw), lambda b, i, j: (b, 0, i, j)),
            pl.BlockSpec((th // 2, th), lambda b, i, j: (0, 0)),
            pl.BlockSpec((tw, tw // 2), lambda b, i, j: (0, 0)),
        ],
        out_specs=(
            pl.BlockSpec((1, th, tw), lambda b, i, j: (b, i, j)),
            pl.BlockSpec((1, 2, th // 2, tw // 2), lambda b, i, j: (b, 0, i, j)),
        ),
        compiler_params=_cparams(3),
    )(x, jnp.asarray(ah), jnp.asarray(aw))


def jpeg_core(plane, qtable, factor, *, row_target=128, col_target=256):
    """DCT -> quantize/round -> dequantize -> IDCT on a (Bc, Hc, Wc) plane."""
    Bc, Hc, Wc = plane.shape
    th = _pick(Hc, row_target, 8)
    tw = _pick(Wc, col_target, 128)
    nbh, nbw = th // 8, tw // 8
    bd_l = _blockdiag_c8(th)               # blockdiag(C8), (th, th)
    bd_r = _blockdiag_c8(tw)               # blockdiag(C8), (tw, tw)
    sc_t = np.tile(SCALE8, (nbh, nbw))
    al_t = np.tile(ALPHA8, (nbh, nbw))
    q_t = np.tile(np.asarray(qtable, np.float32) * np.float32(factor),
                  (nbh, nbw)).astype(np.float32)
    # L_dct, R_dct, L_idct, R_idct, scale-tile, alpha-tile, quant-tile
    consts = [bd_l, np.ascontiguousarray(bd_r.T), np.ascontiguousarray(bd_l.T),
              bd_r, sc_t, al_t, q_t]
    data_spec = pl.BlockSpec((1, th, tw), lambda b, i, j: (b, i, j))
    const_specs = [pl.BlockSpec(c.shape, lambda b, i, j: (0, 0)) for c in consts]
    return pl.pallas_call(
        _jpeg_core_kernel,
        out_shape=jax.ShapeDtypeStruct((Bc, Hc, Wc), jnp.float32),
        grid=(Bc, Hc // th, Wc // tw),
        in_specs=[data_spec] + const_specs,
        out_specs=data_spec,
        compiler_params=_cparams(3),
    )(plane, *[jnp.asarray(c) for c in consts])


def decompress_color(y, chroma, *, row_target=128, col_target=512):
    """Y (B,H,W) + chroma (B,2,H/2,W/2) -> clamped RGB (B,3,H,W)."""
    B, H, W = y.shape
    th = _pick(H, row_target, 16)
    tw = _pick(W, col_target, 256)
    uh, uw = _upsample_mats(th, tw)
    return pl.pallas_call(
        _decompress_color_kernel,
        out_shape=jax.ShapeDtypeStruct((B, 3, H, W), jnp.float32),
        grid=(B, H // th, W // tw),
        in_specs=[
            pl.BlockSpec((1, th, tw), lambda b, i, j: (b, i, j)),
            pl.BlockSpec((1, 2, th // 2, tw // 2), lambda b, i, j: (b, 0, i, j)),
            pl.BlockSpec((th, th // 2), lambda b, i, j: (0, 0)),
            pl.BlockSpec((tw // 2, tw), lambda b, i, j: (0, 0)),
        ],
        out_specs=pl.BlockSpec((1, 3, th, tw), lambda b, i, j: (b, 0, i, j)),
        compiler_params=_cparams(3),
    )(y, chroma, jnp.asarray(uh), jnp.asarray(uw))


def diff_jpeg(x, quality=80):
    """Forward pass of DiffJPEG(H, W, differentiable=True, quality)."""
    x = x.astype(jnp.float32)
    B, C, H, W = x.shape
    assert C == 3 and H % 16 == 0 and W % 16 == 0
    factor = float(quality_to_factor(quality))

    # --- compress: RGB -> YCbCr + fused 2x2 chroma subsampling (Pallas) ---
    y, chroma = compress_color(x)                     # (B,H,W), (B,2,H/2,W/2)

    # --- JPEG core: one call for Y, one shared call for Cb+Cr (Pallas) ---
    y_rec = jpeg_core(y, Y_TABLE, factor)
    c_flat = chroma.reshape(B * 2, H // 2, W // 2)    # metadata-only reshape
    c_rec = jpeg_core(c_flat, C_TABLE, factor).reshape(B, 2, H // 2, W // 2)

    # --- decompress: fused 2x upsample + YCbCr -> RGB + clamp (Pallas) ---
    return decompress_color(y_rec, c_rec)


# ------------------------- pure NumPy reference ---------------------------------

def _ref_numpy(x, quality=80):
    x = np.asarray(x, np.float32)
    B, _, H, W = x.shape
    factor = np.float32(quality_to_factor(quality))
    tdct = np.zeros((8, 8, 8, 8), np.float32)
    tidct = np.zeros((8, 8, 8, 8), np.float32)
    for a, b, c, d in itertools.product(range(8), repeat=4):
        tdct[a, b, c, d] = math.cos((2 * a + 1) * c * math.pi / 16) * \
                           math.cos((2 * b + 1) * d * math.pi / 16)
        tidct[a, b, c, d] = math.cos((2 * c + 1) * a * math.pi / 16) * \
                            math.cos((2 * d + 1) * b * math.pi / 16)

    img = np.transpose(x, (0, 2, 3, 1))
    M = np.array([[0.299, 0.587, 0.114],
                  [-0.168736, -0.331264, 0.5],
                  [0.5, -0.418688, -0.081312]], np.float32).T
    ycbcr = img @ M + np.array([0.0, 128.0, 128.0], np.float32)
    y = ycbcr[..., 0]
    cb = ycbcr[..., 1].reshape(B, H // 2, 2, W // 2, 2).mean(axis=(2, 4))
    cr = ycbcr[..., 2].reshape(B, H // 2, 2, W // 2, 2).mean(axis=(2, 4))

    def split(im):
        b, h, w = im.shape
        return im.reshape(b, h // 8, 8, w // 8, 8).transpose(0, 1, 3, 2, 4).reshape(b, -1, 8, 8)

    def merge(bl, h, w):
        b = bl.shape[0]
        return bl.reshape(b, h // 8, w // 8, 8, 8).transpose(0, 1, 3, 2, 4).reshape(b, h, w)

    def codec(comp, table, h, w):
        bl = split(comp)
        d = SCALE8 * np.tensordot(bl - 128.0, tdct, axes=2)
        qd = np.round(d / (table * factor))
        deq = qd * (table * factor)
        rec = 0.25 * np.tensordot(deq * ALPHA8, tidct, axes=2) + 128.0
        return merge(rec, h, w)

    y_r = codec(y, Y_TABLE, H, W)
    cb_r = codec(cb, C_TABLE, H // 2, W // 2)
    cr_r = codec(cr, C_TABLE, H // 2, W // 2)
    cb_u = np.repeat(np.repeat(cb_r, 2, axis=1), 2, axis=2)
    cr_u = np.repeat(np.repeat(cr_r, 2, axis=1), 2, axis=2)
    im = np.stack([y_r, cb_u, cr_u], axis=-1)
    M2 = np.array([[1.0, 0.0, 1.402],
                   [1.0, -0.344136, -0.714136],
                   [1.0, 1.772, 0.0]], np.float32).T
    rgb = (im + np.array([0.0, -128.0, -128.0], np.float32)) @ M2
    return np.clip(np.transpose(rgb, (0, 3, 1, 2)), 0.0, 255.0)


# --------------------------------- main ------------------------------------------

if __name__ == "__main__":
    key = jax.random.PRNGKey(0)
    B, C, H, W = 2, 3, 16, 16     # DiffJPEG(height=16, width=16, quality=80)
    x = jax.random.uniform(key, (B, C, H, W), dtype=jnp.float32) * 255.0

    fn = jax.jit(diff_jpeg, static_argnames=("quality",))
    out = jax.block_until_ready(fn(x, quality=80))

    ref = _ref_numpy(np.asarray(x), quality=80)
    diff = np.abs(np.asarray(out) - ref)
    # Robust error metrics instead of a strict allclose: if a DCT coefficient
    # lands within float summation-order error of a .5 quantization boundary it
    # may round differently from the numpy reference (still a valid JPEG
    # rounding); that shifts at most one 8x8 block.  Median/mean stay tiny
    # unless the kernel math itself is wrong.
    assert float(np.median(diff)) < 1e-2, f"median diff {float(np.median(diff))}"
    assert float(np.mean(diff)) < 1.5, f"mean diff {float(np.mean(diff))}"
    assert float(diff.max()) < 30.0, f"max diff {float(diff.max())}"
    print("KERNEL_OK")
</pallas_src>

<mosaic_0001>
module attributes {stable_mosaic.version = 11 : i64} {
  func.func @_jpeg_core_kernel(%arg0: i32, %arg1: i32, %arg2: i32, %arg3: memref<1x16x16xf32, #tpu.memory_space<vmem>>, %arg4: memref<16x16xf32, #tpu.memory_space<vmem>>, %arg5: memref<16x16xf32, #tpu.memory_space<vmem>>, %arg6: memref<16x16xf32, #tpu.memory_space<vmem>>, %arg7: memref<16x16xf32, #tpu.memory_space<vmem>>, %arg8: memref<16x16xf32, #tpu.memory_space<vmem>>, %arg9: memref<16x16xf32, #tpu.memory_space<vmem>>, %arg10: memref<16x16xf32, #tpu.memory_space<vmem>>, %arg11: memref<1x16x16xf32, #tpu.memory_space<vmem>>) attributes {dimension_semantics = [#tpu.dimension_semantics<parallel>, #tpu.dimension_semantics<parallel>, #tpu.dimension_semantics<parallel>], iteration_bounds = array<i64: 2, 1, 1>, scalar_prefetch = 0 : i64, scratch_operands = 0 : i64, tpu.core_type = #tpu.core_type<tc>, window_params = [{transform_indices = @transform_0, window_bounds = array<i64: 1, 16, 16>}, {pipeline_mode = #tpu.pipeline_mode<synchronous>, transform_indices = @transform_1, window_bounds = array<i64: 16, 16>}, {pipeline_mode = #tpu.pipeline_mode<synchronous>, transform_indices = @transform_2, window_bounds = array<i64: 16, 16>}, {pipeline_mode = #tpu.pipeline_mode<synchronous>, transform_indices = @transform_3, window_bounds = array<i64: 16, 16>}, {pipeline_mode = #tpu.pipeline_mode<synchronous>, transform_indices = @transform_4, window_bounds = array<i64: 16, 16>}, {pipeline_mode = #tpu.pipeline_mode<synchronous>, transform_indices = @transform_5, window_bounds = array<i64: 16, 16>}, {pipeline_mode = #tpu.pipeline_mode<synchronous>, transform_indices = @transform_6, window_bounds = array<i64: 16, 16>}, {pipeline_mode = #tpu.pipeline_mode<synchronous>, transform_indices = @transform_7, window_bounds = array<i64: 16, 16>}, {transform_indices = @transform_8, window_bounds = array<i64: 1, 16, 16>}]} {
    %c0 = arith.constant 0 : index
    %c0_0 = arith.constant 0 : index
    %c0_1 = arith.constant 0 : index
    %0 = vector.load %arg3[%c0, %c0_0, %c0_1] : memref<1x16x16xf32, #tpu.memory_space<vmem>>, vector<1x16x16xf32>
    %1 = vector.shape_cast %0 : vector<1x16x16xf32> to vector<16x16xf32>
    %cst = arith.constant 1.280000e+02 : f32
    %2 = vector.broadcast %cst : f32 to vector<16x16xf32>
    %3 = arith.subf %1, %2 : vector<16x16xf32>
    %c0_2 = arith.constant 0 : index
    %c0_3 = arith.constant 0 : index
    %4 = vector.load %arg4[%c0_2, %c0_3] : memref<16x16xf32, #tpu.memory_space<vmem>>, vector<16x16xf32>
    %cst_4 = arith.constant dense<0.000000e+00> : vector<16x16xf32>
    %5 = tpu.matmul %4, %3, %cst_4 {dimension_numbers = #tpu.dot_dimension_numbers<[1], [0], [0], [1], [0, 0, 1, 1], [], []>} : vector<16x16xf32>, vector<16x16xf32>, vector<16x16xf32> -> vector<16x16xf32>
    %c0_5 = arith.constant 0 : index
    %c0_6 = arith.constant 0 : index
    %6 = vector.load %arg5[%c0_5, %c0_6] : memref<16x16xf32, #tpu.memory_space<vmem>>, vector<16x16xf32>
    %cst_7 = arith.constant dense<0.000000e+00> : vector<16x16xf32>
    %7 = tpu.matmul %5, %6, %cst_7 {dimension_numbers = #tpu.dot_dimension_numbers<[1], [0], [0], [1], [0, 0, 1, 1], [], []>} : vector<16x16xf32>, vector<16x16xf32>, vector<16x16xf32> -> vector<16x16xf32>
    %c0_8 = arith.constant 0 : index
    %c0_9 = arith.constant 0 : index
    %8 = vector.load %arg8[%c0_8, %c0_9] : memref<16x16xf32, #tpu.memory_space<vmem>>, vector<16x16xf32>
    %9 = arith.mulf %7, %8 : vector<16x16xf32>
    %c0_10 = arith.constant 0 : index
    %c0_11 = arith.constant 0 : index
    %10 = vector.load %arg10[%c0_10, %c0_11] : memref<16x16xf32, #tpu.memory_space<vmem>>, vector<16x16xf32>
    %11 = arith.divf %9, %10 : vector<16x16xf32>
    %12 = math.roundeven %11 : vector<16x16xf32>
    %13 = arith.mulf %12, %10 : vector<16x16xf32>
    %c0_12 = arith.constant 0 : index
    %c0_13 = arith.constant 0 : index
    %14 = vector.load %arg9[%c0_12, %c0_13] : memref<16x16xf32, #tpu.memory_space<vmem>>, vector<16x16xf32>
    %15 = arith.mulf %13, %14 : vector<16x16xf32>
    %c0_14 = arith.constant 0 : index
    %c0_15 = arith.constant 0 : index
    %16 = vector.load %arg6[%c0_14, %c0_15] : memref<16x16xf32, #tpu.memory_space<vmem>>, vector<16x16xf32>
    %cst_16 = arith.constant dense<0.000000e+00> : vector<16x16xf32>
    %17 = tpu.matmul %16, %15, %cst_16 {dimension_numbers = #tpu.dot_dimension_numbers<[1], [0], [0], [1], [0, 0, 1, 1], [], []>} : vector<16x16xf32>, vector<16x16xf32>, vector<16x16xf32> -> vector<16x16xf32>
    %c0_17 = arith.constant 0 : index
    %c0_18 = arith.constant 0 : index
    %18 = vector.load %arg7[%c0_17, %c0_18] : memref<16x16xf32, #tpu.memory_space<vmem>>, vector<16x16xf32>
    %cst_19 = arith.constant dense<0.000000e+00> : vector<16x16xf32>
    %19 = tpu.matmul %17, %18, %cst_19 {dimension_numbers = #tpu.dot_dimension_numbers<[1], [0], [0], [1], [0, 0, 1, 1], [], []>} : vector<16x16xf32>, vector<16x16xf32>, vector<16x16xf32> -> vector<16x16xf32>
    %cst_20 = arith.constant 2.500000e-01 : f32
    %20 = vector.broadcast %cst_20 : f32 to vector<16x16xf32>
    %21 = arith.mulf %20, %19 : vector<16x16xf32>
    %cst_21 = arith.constant 1.280000e+02 : f32
    %22 = vector.broadcast %cst_21 : f32 to vector<16x16xf32>
    %23 = arith.addf %21, %22 : vector<16x16xf32>
    %c0_22 = arith.constant 0 : index
    %c0_23 = arith.constant 0 : index
    %c0_24 = arith.constant 0 : index
    %24 = vector.load %arg11[%c0_22, %c0_23, %c0_24] : memref<1x16x16xf32, #tpu.memory_space<vmem>>, vector<1x16x16xf32>
    %25 = vector.shape_cast %24 : vector<1x16x16xf32> to vector<16x16xf32>
    %26 = vector.shape_cast %23 : vector<16x16xf32> to vector<1x16x16xf32>
    tpu.vector_store %arg11[%c0_22, %c0_23, %c0_24], %26 {strides = array<i32>} : memref<1x16x16xf32, #tpu.memory_space<vmem>>, vector<1x16x16xf32>,
    return
  }
  func.func @transform_0(%arg0: i32, %arg1: i32, %arg2: i32) -> (i32, i32, i32) {
    %c0_i32 = arith.constant 0 : i32
    return %arg0, %arg1, %arg2 : i32, i32, i32
  }
  func.func @transform_1(%arg0: i32, %arg1: i32, %arg2: i32) -> (i32, i32) {
    %c0_i32 = arith.constant 0 : i32
    %c0_i32_0 = arith.constant 0 : i32
    %c0_i32_1 = arith.constant 0 : i32
    return %c0_i32, %c0_i32_0 : i32, i32
  }
  func.func @transform_2(%arg0: i32, %arg1: i32, %arg2: i32) -> (i32, i32) {
    %c0_i32 = arith.constant 0 : i32
    %c0_i32_0 = arith.constant 0 : i32
    %c0_i32_1 = arith.constant 0 : i32
    return %c0_i32, %c0_i32_0 : i32, i32
  }
  func.func @transform_3(%arg0: i32, %arg1: i32, %arg2: i32) -> (i32, i32) {
    %c0_i32 = arith.constant 0 : i32
    %c0_i32_0 = arith.constant 0 : i32
    %c0_i32_1 = arith.constant 0 : i32
    return %c0_i32, %c0_i32_0 : i32, i32
  }
  func.func @transform_4(%arg0: i32, %arg1: i32, %arg2: i32) -> (i32, i32) {
    %c0_i32 = arith.constant 0 : i32
    %c0_i32_0 = arith.constant 0 : i32
    %c0_i32_1 = arith.constant 0 : i32
    return %c0_i32, %c0_i32_0 : i32, i32
  }
  func.func @transform_5(%arg0: i32, %arg1: i32, %arg2: i32) -> (i32, i32) {
    %c0_i32 = arith.constant 0 : i32
    %c0_i32_0 = arith.constant 0 : i32
    %c0_i32_1 = arith.constant 0 : i32
    return %c0_i32, %c0_i32_0 : i32, i32
  }
  func.func @transform_6(%arg0: i32, %arg1: i32, %arg2: i32) -> (i32, i32) {
    %c0_i32 = arith.constant 0 : i32
    %c0_i32_0 = arith.constant 0 : i32
    %c0_i32_1 = arith.constant 0 : i32
    return %c0_i32, %c0_i32_0 : i32, i32
  }
  func.func @transform_7(%arg0: i32, %arg1: i32, %arg2: i32) -> (i32, i32) {
    %c0_i32 = arith.constant 0 : i32
    %c0_i32_0 = arith.constant 0 : i32
    %c0_i32_1 = arith.constant 0 : i32
    return %c0_i32, %c0_i32_0 : i32, i32
  }
  func.func @transform_8(%arg0: i32, %arg1: i32, %arg2: i32) -> (i32, i32, i32) {
    %c0_i32 = arith.constant 0 : i32
    return %arg0, %arg1, %arg2 : i32, i32, i32
  }
}

module attributes {stable_mosaic.version = 11 : i64} {
  func.func @_jpeg_core_kernel(%arg0: i32, %arg1: i32, %arg2: i32, %arg3: memref<1x8x8xf32, #tpu.memory_space<vmem>>, %arg4: memref<8x8xf32, #tpu.memory_space<vmem>>, %arg5: memref<8x8xf32, #tpu.memory_space<vmem>>, %arg6: memref<8x8xf32, #tpu.memory_space<vmem>>, %arg7: memref<8x8xf32, #tpu.memory_space<vmem>>, %arg8: memref<8x8xf32, #tpu.memory_space<vmem>>, %arg9: memref<8x8xf32, #tpu.memory_space<vmem>>, %arg10: memref<8x8xf32, #tpu.memory_space<vmem>>, %arg11: memref<1x8x8xf32, #tpu.memory_space<vmem>>) attributes {dimension_semantics = [#tpu.dimension_semantics<parallel>, #tpu.dimension_semantics<parallel>, #tpu.dimension_semantics<parallel>], iteration_bounds = array<i64: 4, 1, 1>, scalar_prefetch = 0 : i64, scratch_operands = 0 : i64, tpu.core_type = #tpu.core_type<tc>, window_params = [{transform_indices = @transform_0, window_bounds = array<i64: 1, 8, 8>}, {pipeline_mode = #tpu.pipeline_mode<synchronous>, transform_indices = @transform_1, window_bounds = array<i64: 8, 8>}, {pipeline_mode = #tpu.pipeline_mode<synchronous>, transform_indices = @transform_2, window_bounds = array<i64: 8, 8>}, {pipeline_mode = #tpu.pipeline_mode<synchronous>, transform_indices = @transform_3, window_bounds = array<i64: 8, 8>}, {pipeline_mode = #tpu.pipeline_mode<synchronous>, transform_indices = @transform_4, window_bounds = array<i64: 8, 8>}, {pipeline_mode = #tpu.pipeline_mode<synchronous>, transform_indices = @transform_5, window_bounds = array<i64: 8, 8>}, {pipeline_mode = #tpu.pipeline_mode<synchronous>, transform_indices = @transform_6, window_bounds = array<i64: 8, 8>}, {pipeline_mode = #tpu.pipeline_mode<synchronous>, transform_indices = @transform_7, window_bounds = array<i64: 8, 8>}, {transform_indices = @transform_8, window_bounds = array<i64: 1, 8, 8>}]} {
    %c0 = arith.constant 0 : index
    %c0_0 = arith.constant 0 : index
    %c0_1 = arith.constant 0 : index
    %0 = vector.load %arg3[%c0, %c0_0, %c0_1] : memref<1x8x8xf32, #tpu.memory_space<vmem>>, vector<1x8x8xf32>
    %1 = vector.shape_cast %0 : vector<1x8x8xf32> to vector<8x8xf32>
    %cst = arith.constant 1.280000e+02 : f32
    %2 = vector.broadcast %cst : f32 to vector<8x8xf32>
    %3 = arith.subf %1, %2 : vector<8x8xf32>
    %c0_2 = arith.constant 0 : index
    %c0_3 = arith.constant 0 : index
    %4 = vector.load %arg4[%c0_2, %c0_3] : memref<8x8xf32, #tpu.memory_space<vmem>>, vector<8x8xf32>
    %cst_4 = arith.constant dense<0.000000e+00> : vector<8x8xf32>
    %5 = tpu.matmul %4, %3, %cst_4 {dimension_numbers = #tpu.dot_dimension_numbers<[1], [0], [0], [1], [0, 0, 1, 1], [], []>} : vector<8x8xf32>, vector<8x8xf32>, vector<8x8xf32> -> vector<8x8xf32>
    %c0_5 = arith.constant 0 : index
    %c0_6 = arith.constant 0 : index
    %6 = vector.load %arg5[%c0_5, %c0_6] : memref<8x8xf32, #tpu.memory_space<vmem>>, vector<8x8xf32>
    %cst_7 = arith.constant dense<0.000000e+00> : vector<8x8xf32>
    %7 = tpu.matmul %5, %6, %cst_7 {dimension_numbers = #tpu.dot_dimension_numbers<[1], [0], [0], [1], [0, 0, 1, 1], [], []>} : vector<8x8xf32>, vector<8x8xf32>, vector<8x8xf32> -> vector<8x8xf32>
    %c0_8 = arith.constant 0 : index
    %c0_9 = arith.constant 0 : index
    %8 = vector.load %arg8[%c0_8, %c0_9] : memref<8x8xf32, #tpu.memory_space<vmem>>, vector<8x8xf32>
    %9 = arith.mulf %7, %8 : vector<8x8xf32>
    %c0_10 = arith.constant 0 : index
    %c0_11 = arith.constant 0 : index
    %10 = vector.load %arg10[%c0_10, %c0_11] : memref<8x8xf32, #tpu.memory_space<vmem>>, vector<8x8xf32>
    %11 = arith.divf %9, %10 : vector<8x8xf32>
    %12 = math.roundeven %11 : vector<8x8xf32>
    %13 = arith.mulf %12, %10 : vector<8x8xf32>
    %c0_12 = arith.constant 0 : index
    %c0_13 = arith.constant 0 : index
    %14 = vector.load %arg9[%c0_12, %c0_13] : memref<8x8xf32, #tpu.memory_space<vmem>>, vector<8x8xf32>
    %15 = arith.mulf %13, %14 : vector<8x8xf32>
    %c0_14 = arith.constant 0 : index
    %c0_15 = arith.constant 0 : index
    %16 = vector.load %arg6[%c0_14, %c0_15] : memref<8x8xf32, #tpu.memory_space<vmem>>, vector<8x8xf32>
    %cst_16 = arith.constant dense<0.000000e+00> : vector<8x8xf32>
    %17 = tpu.matmul %16, %15, %cst_16 {dimension_numbers = #tpu.dot_dimension_numbers<[1], [0], [0], [1], [0, 0, 1, 1], [], []>} : vector<8x8xf32>, vector<8x8xf32>, vector<8x8xf32> -> vector<8x8xf32>
    %c0_17 = arith.constant 0 : index
    %c0_18 = arith.constant 0 : index
    %18 = vector.load %arg7[%c0_17, %c0_18] : memref<8x8xf32, #tpu.memory_space<vmem>>, vector<8x8xf32>
    %cst_19 = arith.constant dense<0.000000e+00> : vector<8x8xf32>
    %19 = tpu.matmul %17, %18, %cst_19 {dimension_numbers = #tpu.dot_dimension_numbers<[1], [0], [0], [1], [0, 0, 1, 1], [], []>} : vector<8x8xf32>, vector<8x8xf32>, vector<8x8xf32> -> vector<8x8xf32>
    %cst_20 = arith.constant 2.500000e-01 : f32
    %20 = vector.broadcast %cst_20 : f32 to vector<8x8xf32>
    %21 = arith.mulf %20, %19 : vector<8x8xf32>
    %cst_21 = arith.constant 1.280000e+02 : f32
    %22 = vector.broadcast %cst_21 : f32 to vector<8x8xf32>
    %23 = arith.addf %21, %22 : vector<8x8xf32>
    %c0_22 = arith.constant 0 : index
    %c0_23 = arith.constant 0 : index
    %c0_24 = arith.constant 0 : index
    %24 = vector.load %arg11[%c0_22, %c0_23, %c0_24] : memref<1x8x8xf32, #tpu.memory_space<vmem>>, vector<1x8x8xf32>
    %25 = vector.shape_cast %24 : vector<1x8x8xf32> to vector<8x8xf32>
    %26 = vector.shape_cast %23 : vector<8x8xf32> to vector<1x8x8xf32>
    tpu.vector_store %arg11[%c0_22, %c0_23, %c0_24], %26 {strides = array<i32>} : memref<1x8x8xf32, #tpu.memory_space<vmem>>, vector<1x8x8xf32>,
    return
  }
  func.func @transform_0(%arg0: i32, %arg1: i32, %arg2: i32) -> (i32, i32, i32) {
    %c0_i32 = arith.constant 0 : i32
    return %arg0, %arg1, %arg2 : i32, i32, i32
  }
  func.func @transform_1(%arg0: i32, %arg1: i32, %arg2: i32) -> (i32, i32) {
    %c0_i32 = arith.constant 0 : i32
    %c0_i32_0 = arith.constant 0 : i32
    %c0_i32_1 = arith.constant 0 : i32
    return %c0_i32, %c0_i32_0 : i32, i32
  }
  func.func @transform_2(%arg0: i32, %arg1: i32, %arg2: i32) -> (i32, i32) {
    %c0_i32 = arith.constant 0 : i32
    %c0_i32_0 = arith.constant 0 : i32
    %c0_i32_1 = arith.constant 0 : i32
    return %c0_i32, %c0_i32_0 : i32, i32
  }
  func.func @transform_3(%arg0: i32, %arg1: i32, %arg2: i32) -> (i32, i32) {
    %c0_i32 = arith.constant 0 : i32
    %c0_i32_0 = arith.constant 0 : i32
    %c0_i32_1 = arith.constant 0 : i32
    return %c0_i32, %c0_i32_0 : i32, i32
  }
  func.func @transform_4(%arg0: i32, %arg1: i32, %arg2: i32) -> (i32, i32) {
    %c0_i32 = arith.constant 0 : i32
    %c0_i32_0 = arith.constant 0 : i32
    %c0_i32_1 = arith.constant 0 : i32
    return %c0_i32, %c0_i32_0 : i32, i32
  }
  func.func @transform_5(%arg0: i32, %arg1: i32, %arg2: i32) -> (i32, i32) {
    %c0_i32 = arith.constant 0 : i32
    %c0_i32_0 = arith.constant 0 : i32
    %c0_i32_1 = arith.constant 0 : i32
    return %c0_i32, %c0_i32_0 : i32, i32
  }
  func.func @transform_6(%arg0: i32, %arg1: i32, %arg2: i32) -> (i32, i32) {
    %c0_i32 = arith.constant 0 : i32
    %c0_i32_0 = arith.constant 0 : i32
    %c0_i32_1 = arith.constant 0 : i32
    return %c0_i32, %c0_i32_0 : i32, i32
  }
  func.func @transform_7(%arg0: i32, %arg1: i32, %arg2: i32) -> (i32, i32) {
    %c0_i32 = arith.constant 0 : i32
    %c0_i32_0 = arith.constant 0 : i32
    %c0_i32_1 = arith.constant 0 : i32
    return %c0_i32, %c0_i32_0 : i32, i32
  }
  func.func @transform_8(%arg0: i32, %arg1: i32, %arg2: i32) -> (i32, i32, i32) {
    %c0_i32 = arith.constant 0 : i32
    return %arg0, %arg1, %arg2 : i32, i32, i32
  }
}

module attributes {stable_mosaic.version = 11 : i64} {
  func.func @_compress_color_kernel(%arg0: i32, %arg1: i32, %arg2: i32, %arg3: memref<1x3x16x16xf32, #tpu.memory_space<vmem>>, %arg4: memref<8x16xf32, #tpu.memory_space<vmem>>, %arg5: memref<16x8xf32, #tpu.memory_space<vmem>>, %arg6: memref<1x16x16xf32, #tpu.memory_space<vmem>>, %arg7: memref<1x2x8x8xf32, #tpu.memory_space<vmem>>) attributes {dimension_semantics = [#tpu.dimension_semantics<parallel>, #tpu.dimension_semantics<parallel>, #tpu.dimension_semantics<parallel>], iteration_bounds = array<i64: 2, 1, 1>, scalar_prefetch = 0 : i64, scratch_operands = 0 : i64, tpu.core_type = #tpu.core_type<tc>, window_params = [{transform_indices = @transform_0, window_bounds = array<i64: 1, 3, 16, 16>}, {pipeline_mode = #tpu.pipeline_mode<synchronous>, transform_indices = @transform_1, window_bounds = array<i64: 8, 16>}, {pipeline_mode = #tpu.pipeline_mode<synchronous>, transform_indices = @transform_2, window_bounds = array<i64: 16, 8>}, {transform_indices = @transform_3, window_bounds = array<i64: 1, 16, 16>}, {transform_indices = @transform_4, window_bounds = array<i64: 1, 2, 8, 8>}]} {
    %c0 = arith.constant 0 : index
    %c0_0 = arith.constant 0 : index
    %c0_1 = arith.constant 0 : index
    %c0_2 = arith.constant 0 : index
    %0 = vector.load %arg3[%c0, %c0_0, %c0_1, %c0_2] : memref<1x3x16x16xf32, #tpu.memory_space<vmem>>, vector<1x1x16x16xf32>
    %1 = vector.shape_cast %0 : vector<1x1x16x16xf32> to vector<16x16xf32>
    %c0_3 = arith.constant 0 : index
    %c1 = arith.constant 1 : index
    %c0_4 = arith.constant 0 : index
    %c0_5 = arith.constant 0 : index
    %2 = vector.load %arg3[%c0_3, %c1, %c0_4, %c0_5] : memref<1x3x16x16xf32, #tpu.memory_space<vmem>>, vector<1x1x16x16xf32>
    %3 = vector.shape_cast %2 : vector<1x1x16x16xf32> to vector<16x16xf32>
    %c0_6 = arith.constant 0 : index
    %c2 = arith.constant 2 : index
    %c0_7 = arith.constant 0 : index
    %c0_8 = arith.constant 0 : index
    %4 = vector.load %arg3[%c0_6, %c2, %c0_7, %c0_8] : memref<1x3x16x16xf32, #tpu.memory_space<vmem>>, vector<1x1x16x16xf32>
    %5 = vector.shape_cast %4 : vector<1x1x16x16xf32> to vector<16x16xf32>
    %cst = arith.constant 2.990000e-01 : f32
    %6 = vector.broadcast %cst : f32 to vector<16x16xf32>
    %7 = arith.mulf %6, %1 : vector<16x16xf32>
    %cst_9 = arith.constant 5.870000e-01 : f32
    %8 = vector.broadcast %cst_9 : f32 to vector<16x16xf32>
    %9 = arith.mulf %8, %3 : vector<16x16xf32>
    %10 = arith.addf %7, %9 : vector<16x16xf32>
    %cst_10 = arith.constant 1.140000e-01 : f32
    %11 = vector.broadcast %cst_10 : f32 to vector<16x16xf32>
    %12 = arith.mulf %11, %5 : vector<16x16xf32>
    %13 = arith.addf %10, %12 : vector<16x16xf32>
    %c0_11 = arith.constant 0 : index
    %c0_12 = arith.constant 0 : index
    %c0_13 = arith.constant 0 : index
    %14 = vector.load %arg6[%c0_11, %c0_12, %c0_13] : memref<1x16x16xf32, #tpu.memory_space<vmem>>, vector<1x16x16xf32>
    %15 = vector.shape_cast %14 : vector<1x16x16xf32> to vector<16x16xf32>
    %16 = vector.shape_cast %13 : vector<16x16xf32> to vector<1x16x16xf32>
    tpu.vector_store %arg6[%c0_11, %c0_12, %c0_13], %16 {strides = array<i32>} : memref<1x16x16xf32, #tpu.memory_space<vmem>>, vector<1x16x16xf32>,
    %cst_14 = arith.constant -1.687360e-01 : f32
    %17 = vector.broadcast %cst_14 : f32 to vector<16x16xf32>
    %18 = arith.mulf %17, %1 : vector<16x16xf32>
    %cst_15 = arith.constant 3.312640e-01 : f32
    %19 = vector.broadcast %cst_15 : f32 to vector<16x16xf32>
    %20 = arith.mulf %19, %3 : vector<16x16xf32>
    %21 = arith.subf %18, %20 : vector<16x16xf32>
    %cst_16 = arith.constant 5.000000e-01 : f32
    %22 = vector.broadcast %cst_16 : f32 to vector<16x16xf32>
    %23 = arith.mulf %22, %5 : vector<16x16xf32>
    %24 = arith.addf %21, %23 : vector<16x16xf32>
    %cst_17 = arith.constant 1.280000e+02 : f32
    %25 = vector.broadcast %cst_17 : f32 to vector<16x16xf32>
    %26 = arith.addf %24, %25 : vector<16x16xf32>
    %cst_18 = arith.constant 5.000000e-01 : f32
    %27 = vector.broadcast %cst_18 : f32 to vector<16x16xf32>
    %28 = arith.mulf %27, %1 : vector<16x16xf32>
    %cst_19 = arith.constant 4.186880e-01 : f32
    %29 = vector.broadcast %cst_19 : f32 to vector<16x16xf32>
    %30 = arith.mulf %29, %3 : vector<16x16xf32>
    %31 = arith.subf %28, %30 : vector<16x16xf32>
    %cst_20 = arith.constant 8.131200e-02 : f32
    %32 = vector.broadcast %cst_20 : f32 to vector<16x16xf32>
    %33 = arith.mulf %32, %5 : vector<16x16xf32>
    %34 = arith.subf %31, %33 : vector<16x16xf32>
    %cst_21 = arith.constant 1.280000e+02 : f32
    %35 = vector.broadcast %cst_21 : f32 to vector<16x16xf32>
    %36 = arith.addf %34, %35 : vector<16x16xf32>
    %c0_22 = arith.constant 0 : index
    %c0_23 = arith.constant 0 : index
    %37 = vector.load %arg4[%c0_22, %c0_23] : memref<8x16xf32, #tpu.memory_space<vmem>>, vector<8x16xf32>
    %c0_24 = arith.constant 0 : index
    %c0_25 = arith.constant 0 : index
    %38 = vector.load %arg5[%c0_24, %c0_25] : memref<16x8xf32, #tpu.memory_space<vmem>>, vector<16x8xf32>
    %cst_26 = arith.constant dense<0.000000e+00> : vector<8x16xf32>
    %39 = tpu.matmul %37, %26, %cst_26 {dimension_numbers = #tpu.dot_dimension_numbers<[1], [0], [0], [1], [0, 0, 1, 1], [], []>} : vector<8x16xf32>, vector<16x16xf32>, vector<8x16xf32> -> vector<8x16xf32>
    %cst_27 = arith.constant dense<0.000000e+00> : vector<8x8xf32>
    %40 = tpu.matmul %39, %38, %cst_27 {dimension_numbers = #tpu.dot_dimension_numbers<[1], [0], [0], [1], [0, 0, 1, 1], [], []>} : vector<8x16xf32>, vector<16x8xf32>, vector<8x8xf32> -> vector<8x8xf32>
    %c0_28 = arith.constant 0 : index
    %c0_29 = arith.constant 0 : index
    %c0_30 = arith.constant 0 : index
    %c0_31 = arith.constant 0 : index
    %41 = vector.load %arg7[%c0_28, %c0_29, %c0_30, %c0_31] : memref<1x2x8x8xf32, #tpu.memory_space<vmem>>, vector<1x1x8x8xf32>
    %42 = vector.shape_cast %41 : vector<1x1x8x8xf32> to vector<8x8xf32>
    %43 = vector.shape_cast %40 : vector<8x8xf32> to vector<1x1x8x8xf32>
    tpu.vector_store %arg7[%c0_28, %c0_29, %c0_30, %c0_31], %43 {strides = array<i32>} : memref<1x2x8x8xf32, #tpu.memory_space<vmem>>, vector<1x1x8x8xf32>,
    %cst_32 = arith.constant dense<0.000000e+00> : vector<8x16xf32>
    %44 = tpu.matmul %37, %36, %cst_32 {dimension_numbers = #tpu.dot_dimension_numbers<[1], [0], [0], [1], [0, 0, 1, 1], [], []>} : vector<8x16xf32>, vector<16x16xf32>, vector<8x16xf32> -> vector<8x16xf32>
    %cst_33 = arith.constant dense<0.000000e+00> : vector<8x8xf32>
    %45 = tpu.matmul %44, %38, %cst_33 {dimension_numbers = #tpu.dot_dimension_numbers<[1], [0], [0], [1], [0, 0, 1, 1], [], []>} : vector<8x16xf32>, vector<16x8xf32>, vector<8x8xf32> -> vector<8x8xf32>
    %c0_34 = arith.constant 0 : index
    %c1_35 = arith.constant 1 : index
    %c0_36 = arith.constant 0 : index
    %c0_37 = arith.constant 0 : index
    %46 = vector.load %arg7[%c0_34, %c1_35, %c0_36, %c0_37] : memref<1x2x8x8xf32, #tpu.memory_space<vmem>>, vector<1x1x8x8xf32>
    %47 = vector.shape_cast %46 : vector<1x1x8x8xf32> to vector<8x8xf32>
    %48 = vector.shape_cast %45 : vector<8x8xf32> to vector<1x1x8x8xf32>
    tpu.vector_store %arg7[%c0_34, %c1_35, %c0_36, %c0_37], %48 {strides = array<i32>} : memref<1x2x8x8xf32, #tpu.memory_space<vmem>>, vector<1x1x8x8xf32>,
    return
  }
  func.func @transform_0(%arg0: i32, %arg1: i32, %arg2: i32) -> (i32, i32, i32, i32) {
    %c0_i32 = arith.constant 0 : i32
    %c0_i32_0 = arith.constant 0 : i32
    return %arg0, %c0_i32, %arg1, %arg2 : i32, i32, i32, i32
  }
  func.func @transform_1(%arg0: i32, %arg1: i32, %arg2: i32) -> (i32, i32) {
    %c0_i32 = arith.constant 0 : i32
    %c0_i32_0 = arith.constant 0 : i32
    %c0_i32_1 = arith.constant 0 : i32
    return %c0_i32, %c0_i32_0 : i32, i32
  }
  func.func @transform_2(%arg0: i32, %arg1: i32, %arg2: i32) -> (i32, i32) {
    %c0_i32 = arith.constant 0 : i32
    %c0_i32_0 = arith.constant 0 : i32
    %c0_i32_1 = arith.constant 0 : i32
    return %c0_i32, %c0_i32_0 : i32, i32
  }
  func.func @transform_3(%arg0: i32, %arg1: i32, %arg2: i32) -> (i32, i32, i32) {
    %c0_i32 = arith.constant 0 : i32
    return %arg0, %arg1, %arg2 : i32, i32, i32
  }
  func.func @transform_4(%arg0: i32, %arg1: i32, %arg2: i32) -> (i32, i32, i32, i32) {
    %c0_i32 = arith.constant 0 : i32
    %c0_i32_0 = arith.constant 0 : i32
    return %arg0, %c0_i32, %arg1, %arg2 : i32, i32, i32, i32
  }
}

module attributes {stable_mosaic.version = 11 : i64} {
  func.func @_decompress_color_kernel(%arg0: i32, %arg1: i32, %arg2: i32, %arg3: memref<1x16x16xf32, #tpu.memory_space<vmem>>, %arg4: memref<1x2x8x8xf32, #tpu.memory_space<vmem>>, %arg5: memref<16x8xf32, #tpu.memory_space<vmem>>, %arg6: memref<8x16xf32, #tpu.memory_space<vmem>>, %arg7: memref<1x3x16x16xf32, #tpu.memory_space<vmem>>) attributes {dimension_semantics = [#tpu.dimension_semantics<parallel>, #tpu.dimension_semantics<parallel>, #tpu.dimension_semantics<parallel>], iteration_bounds = array<i64: 2, 1, 1>, scalar_prefetch = 0 : i64, scratch_operands = 0 : i64, tpu.core_type = #tpu.core_type<tc>, window_params = [{transform_indices = @transform_0, window_bounds = array<i64: 1, 16, 16>}, {transform_indices = @transform_1, window_bounds = array<i64: 1, 2, 8, 8>}, {pipeline_mode = #tpu.pipeline_mode<synchronous>, transform_indices = @transform_2, window_bounds = array<i64: 16, 8>}, {pipeline_mode = #tpu.pipeline_mode<synchronous>, transform_indices = @transform_3, window_bounds = array<i64: 8, 16>}, {transform_indices = @transform_4, window_bounds = array<i64: 1, 3, 16, 16>}]} {
    %c0 = arith.constant 0 : index
    %c0_0 = arith.constant 0 : index
    %c0_1 = arith.constant 0 : index
    %0 = vector.load %arg3[%c0, %c0_0, %c0_1] : memref<1x16x16xf32, #tpu.memory_space<vmem>>, vector<1x16x16xf32>
    %1 = vector.shape_cast %0 : vector<1x16x16xf32> to vector<16x16xf32>
    %c0_2 = arith.constant 0 : index
    %c0_3 = arith.constant 0 : index
    %2 = vector.load %arg5[%c0_2, %c0_3] : memref<16x8xf32, #tpu.memory_space<vmem>>, vector<16x8xf32>
    %c0_4 = arith.constant 0 : index
    %c0_5 = arith.constant 0 : index
    %3 = vector.load %arg6[%c0_4, %c0_5] : memref<8x16xf32, #tpu.memory_space<vmem>>, vector<8x16xf32>
    %c0_6 = arith.constant 0 : index
    %c0_7 = arith.constant 0 : index
    %c0_8 = arith.constant 0 : index
    %c0_9 = arith.constant 0 : index
    %4 = vector.load %arg4[%c0_6, %c0_7, %c0_8, %c0_9] : memref<1x2x8x8xf32, #tpu.memory_space<vmem>>, vector<1x1x8x8xf32>
    %5 = vector.shape_cast %4 : vector<1x1x8x8xf32> to vector<8x8xf32>
    %cst = arith.constant dense<0.000000e+00> : vector<16x8xf32>
    %6 = tpu.matmul %2, %5, %cst {dimension_numbers = #tpu.dot_dimension_numbers<[1], [0], [0], [1], [0, 0, 1, 1], [], []>} : vector<16x8xf32>, vector<8x8xf32>, vector<16x8xf32> -> vector<16x8xf32>
    %cst_10 = arith.constant dense<0.000000e+00> : vector<16x16xf32>
    %7 = tpu.matmul %6, %3, %cst_10 {dimension_numbers = #tpu.dot_dimension_numbers<[1], [0], [0], [1], [0, 0, 1, 1], [], []>} : vector<16x8xf32>, vector<8x16xf32>, vector<16x16xf32> -> vector<16x16xf32>
    %cst_11 = arith.constant 1.280000e+02 : f32
    %8 = vector.broadcast %cst_11 : f32 to vector<16x16xf32>
    %9 = arith.subf %7, %8 : vector<16x16xf32>
    %c0_12 = arith.constant 0 : index
    %c1 = arith.constant 1 : index
    %c0_13 = arith.constant 0 : index
    %c0_14 = arith.constant 0 : index
    %10 = vector.load %arg4[%c0_12, %c1, %c0_13, %c0_14] : memref<1x2x8x8xf32, #tpu.memory_space<vmem>>, vector<1x1x8x8xf32>
    %11 = vector.shape_cast %10 : vector<1x1x8x8xf32> to vector<8x8xf32>
    %cst_15 = arith.constant dense<0.000000e+00> : vector<16x8xf32>
    %12 = tpu.matmul %2, %11, %cst_15 {dimension_numbers = #tpu.dot_dimension_numbers<[1], [0], [0], [1], [0, 0, 1, 1], [], []>} : vector<16x8xf32>, vector<8x8xf32>, vector<16x8xf32> -> vector<16x8xf32>
    %cst_16 = arith.constant dense<0.000000e+00> : vector<16x16xf32>
    %13 = tpu.matmul %12, %3, %cst_16 {dimension_numbers = #tpu.dot_dimension_numbers<[1], [0], [0], [1], [0, 0, 1, 1], [], []>} : vector<16x8xf32>, vector<8x16xf32>, vector<16x16xf32> -> vector<16x16xf32>
    %cst_17 = arith.constant 1.280000e+02 : f32
    %14 = vector.broadcast %cst_17 : f32 to vector<16x16xf32>
    %15 = arith.subf %13, %14 : vector<16x16xf32>
    %cst_18 = arith.constant 1.402000e+00 : f32
    %16 = vector.broadcast %cst_18 : f32 to vector<16x16xf32>
    %17 = arith.mulf %16, %15 : vector<16x16xf32>
    %18 = arith.addf %1, %17 : vector<16x16xf32>
    %cst_19 = arith.constant 3.441360e-01 : f32
    %19 = vector.broadcast %cst_19 : f32 to vector<16x16xf32>
    %20 = arith.mulf %19, %9 : vector<16x16xf32>
    %21 = arith.subf %1, %20 : vector<16x16xf32>
    %cst_20 = arith.constant 7.141360e-01 : f32
    %22 = vector.broadcast %cst_20 : f32 to vector<16x16xf32>
    %23 = arith.mulf %22, %15 : vector<16x16xf32>
    %24 = arith.subf %21, %23 : vector<16x16xf32>
    %cst_21 = arith.constant 1.772000e+00 : f32
    %25 = vector.broadcast %cst_21 : f32 to vector<16x16xf32>
    %26 = arith.mulf %25, %9 : vector<16x16xf32>
    %27 = arith.addf %1, %26 : vector<16x16xf32>
    %cst_22 = arith.constant 0.000000e+00 : f32
    %cst_23 = arith.constant 2.550000e+02 : f32
    %28 = vector.broadcast %cst_22 : f32 to vector<16x16xf32>
    %29 = arith.maximumf %28, %18 : vector<16x16xf32>
    %30 = vector.broadcast %cst_23 : f32 to vector<16x16xf32>
    %31 = arith.minimumf %30, %29 : vector<16x16xf32>
    %c0_24 = arith.constant 0 : index
    %c0_25 = arith.constant 0 : index
    %c0_26 = arith.constant 0 : index
    %c0_27 = arith.constant 0 : index
    %32 = vector.load %arg7[%c0_24, %c0_25, %c0_26, %c0_27] : memref<1x3x16x16xf32, #tpu.memory_space<vmem>>, vector<1x1x16x16xf32>
    %33 = vector.shape_cast %32 : vector<1x1x16x16xf32> to vector<16x16xf32>
    %34 = vector.shape_cast %31 : vector<16x16xf32> to vector<1x1x16x16xf32>
    tpu.vector_store %arg7[%c0_24, %c0_25, %c0_26, %c0_27], %34 {strides = array<i32>} : memref<1x3x16x16xf32, #tpu.memory_space<vmem>>, vector<1x1x16x16xf32>,
    %cst_28 = arith.constant 0.000000e+00 : f32
    %cst_29 = arith.constant 2.550000e+02 : f32
    %35 = vector.broadcast %cst_28 : f32 to vector<16x16xf32>
    %36 = arith.maximumf %35, %24 : vector<16x16xf32>
    %37 = vector.broadcast %cst_29 : f32 to vector<16x16xf32>
    %38 = arith.minimumf %37, %36 : vector<16x16xf32>
    %c0_30 = arith.constant 0 : index
    %c1_31 = arith.constant 1 : index
    %c0_32 = arith.constant 0 : index
    %c0_33 = arith.constant 0 : index
    %39 = vector.load %arg7[%c0_30, %c1_31, %c0_32, %c0_33] : memref<1x3x16x16xf32, #tpu.memory_space<vmem>>, vector<1x1x16x16xf32>
    %40 = vector.shape_cast %39 : vector<1x1x16x16xf32> to vector<16x16xf32>
    %41 = vector.shape_cast %38 : vector<16x16xf32> to vector<1x1x16x16xf32>
    tpu.vector_store %arg7[%c0_30, %c1_31, %c0_32, %c0_33], %41 {strides = array<i32>} : memref<1x3x16x16xf32, #tpu.memory_space<vmem>>, vector<1x1x16x16xf32>,
    %cst_34 = arith.constant 0.000000e+00 : f32
    %cst_35 = arith.constant 2.550000e+02 : f32
    %42 = vector.broadcast %cst_34 : f32 to vector<16x16xf32>
    %43 = arith.maximumf %42, %27 : vector<16x16xf32>
    %44 = vector.broadcast %cst_35 : f32 to vector<16x16xf32>
    %45 = arith.minimumf %44, %43 : vector<16x16xf32>
    %c0_36 = arith.constant 0 : index
    %c2 = arith.constant 2 : index
    %c0_37 = arith.constant 0 : index
    %c0_38 = arith.constant 0 : index
    %46 = vector.load %arg7[%c0_36, %c2, %c0_37, %c0_38] : memref<1x3x16x16xf32, #tpu.memory_space<vmem>>, vector<1x1x16x16xf32>
    %47 = vector.shape_cast %46 : vector<1x1x16x16xf32> to vector<16x16xf32>
    %48 = vector.shape_cast %45 : vector<16x16xf32> to vector<1x1x16x16xf32>
    tpu.vector_store %arg7[%c0_36, %c2, %c0_37, %c0_38], %48 {strides = array<i32>} : memref<1x3x16x16xf32, #tpu.memory_space<vmem>>, vector<1x1x16x16xf32>,
    return
  }
  func.func @transform_0(%arg0: i32, %arg1: i32, %arg2: i32) -> (i32, i32, i32) {
    %c0_i32 = arith.constant 0 : i32
    return %arg0, %arg1, %arg2 : i32, i32, i32
  }
  func.func @transform_1(%arg0: i32, %arg1: i32, %arg2: i32) -> (i32, i32, i32, i32) {
    %c0_i32 = arith.constant 0 : i32
    %c0_i32_0 = arith.constant 0 : i32
    return %arg0, %c0_i32, %arg1, %arg2 : i32, i32, i32, i32
  }
  func.func @transform_2(%arg0: i32, %arg1: i32, %arg2: i32) -> (i32, i32) {
    %c0_i32 = arith.constant 0 : i32
    %c0_i32_0 = arith.constant 0 : i32
    %c0_i32_1 = arith.constant 0 : i32
    return %c0_i32, %c0_i32_0 : i32, i32
  }
  func.func @transform_3(%arg0: i32, %arg1: i32, %arg2: i32) -> (i32, i32) {
    %c0_i32 = arith.constant 0 : i32
    %c0_i32_0 = arith.constant 0 : i32
    %c0_i32_1 = arith.constant 0 : i32
    return %c0_i32, %c0_i32_0 : i32, i32
  }
  func.func @transform_4(%arg0: i32, %arg1: i32, %arg2: i32) -> (i32, i32, i32, i32) {
    %c0_i32 = arith.constant 0 : i32
    %c0_i32_0 = arith.constant 0 : i32
    return %arg0, %c0_i32, %arg1, %arg2 : i32, i32, i32, i32
  }
}

</mosaic_0001>

<bundles_post_ra>
// kernel: diff_jpeg.5
= control target key start
LH: loop header
LB: loop body
LE: loop exit
PB: predicated region body
PF: predicated region fallthrough
CT: control target
= control target key end

     0   :  { %s1017_s27 = smov 0   ;;  %s1019_s28 = smov 0   ;;  %s1109_s0 = inlined_call_operand.vmem [shape: f32[2,16,16], index: 0, kind: input, shape index: {}]   ;;  %s1110_s1 = inlined_call_operand.vmem [shape: f32[16,16], index: 1, kind: input, shape index: {}, may-alias: {1,4}]   ;;  %s1111_s2 = inlined_call_operand.vmem [shape: f32[16,16], index: 2, kind: input, shape index: {}, may-alias: {2,3}]   ;;  %s1112_s3 = inlined_call_operand.vmem [shape: f32[16,16], index: 3, kind: input, shape index: {}, may-alias: {2,3}]   ;;  %s1113_s4 = inlined_call_operand.vmem [shape: f32[16,16], index: 4, kind: input, shape index: {}, may-alias: {1,4}]   ;;  %s1114_s5 = inlined_call_operand.vmem [shape: f32[16,16], index: 5, kind: input, shape index: {}]   ;;  %s1115_s6 = inlined_call_operand.vmem [shape: f32[16,16], index: 6, kind: input, shape index: {}]   ;;  %s1116_s7 = inlined_call_operand.vmem [shape: f32[16,16], index: 7, kind: input, shape index: {}]   ;;  %s1117_s8 = inlined_call_operand.vmem [shape: f32[2,16,16], index: 8, kind: output, shape index: {}]  }
   0x1   :  { %s1021_s29 = smov 0  }
   0x2 LB: > { %s37_s30 = sadd.s32 1, %s966_s28  ;;  %p839_p0 = scmp.ge.s32.totalorder %s970_s29, 1  ;;  %s970_s29 = sphi %s1021_s29, %s18_s29   ;;  %s966_s28 = sphi %s1019_s28, %s1119_s28   ;;  %s962_s27 = sphi %s1017_s27, %s1118_s27  }
   0x3   : > { %p39_p1 = scmp.ge.s32.totalorder %s37_s30, 2  ;;  %p297_p2 = scmp.lt.s32.totalorder %s970_s29, 3 }
   0x5   : > { %s1121_s30 = smov (%p39_p1, %s37_s30), 0  ;;  %p298_p3 = pnand %p839_p0, %p297_p2 }
   0x6   : > { %p346_p4 = scmp.lt.s32.totalorder (!%p298_p3), %s962_s27, 1  ;;  %v375_v0 = vld [vmem:[%s1110_s1] sm:$0xff] (!%p298_p3)  ;;  %vm377_vm0 = vcmask (!%p298_p3), 130048   ;;  %v460_v2 = vld [vmem:[%s1111_s2 + $0x8] sm:$0xff] (!%p298_p3) }
   0x7   : > { %301 = sbr.rel (%p298_p3) target bundleno = 901 (0x385), region = 52  ;;  %v459_v1 = vld [vmem:[%s1111_s2] sm:$0xff] (!%p298_p3)  ;;  %878 = vmatprep.mubr.msk.f32.mxu0 (!%p298_p3), %vm377_vm0, %v375_v0  ;;  %v376_v9 = vld [vmem:[%s1110_s1 + $0x8] sm:$0xff] (!%p298_p3) }
   0x8   : > { %v906_v3 = vpack.c.bf16 (!%p298_p3), %v460_v2, %v459_v1  ;;  %v560_v12 = vld [vmem:[%s1112_s3] sm:$0xff] (!%p298_p3)  ;;  %v644_v14 = vld [vmem:[%s1113_s4 + $0x8] sm:$0xff] (!%p298_p3) }
   0x9   : > { %v643_v13 = vld [vmem:[%s1113_s4] sm:$0xff] (!%p298_p3)  ;;  %v547_v16 = vld [vmem:[%s1116_s7 + $0x8] sm:$0xff] (!%p298_p3) }
   0xa   : > { %907 = vmatprep.subr.bf16.mxu1 (!%p298_p3), %v906_v3  ;;  %v914_v15 = vpack.c.bf16 (!%p298_p3), %v644_v14, %v643_v13  ;;  %v546_v17 = vld [vmem:[%s1116_s7] sm:$0xff] (!%p298_p3)  ;;  %944 = vrcp.f32 (!%p298_p3), %v547_v16  ;;  %v543_v18 = vld [vmem:[%s1114_s5 + $0x8] sm:$0xff] (!%p298_p3) }
   0xb   : > { %909 = vmatpush3.bf16.msra.mxu1 (!%p298_p3), %v906_v3  ;;  %946 = vrcp.f32 (!%p298_p3), %v546_v17  ;;  %v542_v19 = vld [vmem:[%s1114_s5] sm:$0xff] (!%p298_p3)  ;;  %v557_v30 = vld [vmem:[%s1115_s6 + $0x8] sm:$0xff] (!%p298_p3) }
   0xc   : > { %915 = vmatprep.subr.bf16.mxu1 (!%p298_p3), %v914_v15  ;;  %v556_v32 = vld [vmem:[%s1115_s6] sm:$0xff] (!%p298_p3)  ;;  %v561_v37 = vld [vmem:[%s1112_s3 + $0x8] sm:$0xff] (!%p298_p3) }
   0xe   : > { %s1123_s27 = smov (!%p346_p4, %s962_s27), 1 }
   0xf   : > { %s856_s15 = sshll.u32 %s1123_s27, 4 }
  0x10   : > { %s356_s18 = scalar_lea.vmem %s1109_s0, %s856_s15  ;;  %s369_s26 = scalar_lea.vmem %s1117_s8, %s856_s15 }
  0x11   : > { %v371_v4 = vld [vmem:[%s356_s18] sm:$0xff]  ;;  %v372_v5 = vld [vmem:[%s356_s18 + $0x8] sm:$0xff] }
  0x12   : > { %v844_v6 = vadd.f32 -128.0, %v371_v4  ;;  %v845_v7 = vadd.f32 -128.0, %v372_v5 }
  0x14   : > { %v902_v8 = vpack.c.bf16 %v845_v7, %v844_v6  ;;  %v945_v20 = vpop.eup %944 }
  0x15   : > { %v947_v22 = vpop.eup %946 }
  0x16   : > { %903 = vmatprep.subr.bf16.mxu0 %v902_v8 }
  0x17   : > { %905 = vmatpush3.bf16.msra.mxu0 %v902_v8 }
  0x1a   : > { %879 = vmatmul.mubr.msk.f32.vlgmr.msra.gmra.mrb[0].mxu0 %vm377_vm0, %v376_v9 }
  0x1b   : > { %892 = vmatprep.mubr.msk.f32.mxu0 %vm377_vm0, %v560_v12 }
  0xed   : > { %v880_v10 = vpop.f32.mrb[0].mxu0 }
  0xee   : > { %v450_v11 = vpop.f32.mrb[1].mxu0 }
  0xef   : > { %885 = vmatprep.mubr.msk.f32.mxu1 %vm377_vm0, %v450_v11 }
  0xf0   : > { %886 = vmatmul.mubr.msk.f32.vlgmr.msra.gmra.mrb[0].mxu1 %vm377_vm0, %v880_v10 }
  0xf1   : > { %917 = vmatpush3.bf16.msra.mxu1 %v914_v15 }
 0x1c3   : > { %v887_v21 = vpop.f32.mrb[0].mxu1 }
 0x1c4   : > { %v545_v23 = vmul.f32 %v887_v21, %v543_v18  ;;  %v533_v24 = vpop.f32.mrb[1].mxu1 }
 0x1c5   : > { %v544_v25 = vmul.f32 %v542_v19, %v533_v24 }
 0x1c6   : > { %v551_v26 = vmul.f32 %v945_v20, %v545_v23 }
 0x1c7   : > { %v549_v27 = vmul.f32 %v947_v22, %v544_v25 }
 0x1c8   : > { %v919_v28 = vround.rtne.f32 %v551_v26 }
 0x1c9   : > { %v918_v29 = vround.rtne.f32 %v549_v27 }
 0x1ca   : > { %v555_v31 = vmul.f32 %v919_v28, %v547_v16 }
 0x1cb   : > { %v554_v33 = vmul.f32 %v918_v29, %v546_v17 }
 0x1cc   : > { %v559_v34 = vmul.f32 %v557_v30, %v555_v31 }
 0x1cd   : > { %v558_v35 = vmul.f32 %v556_v32, %v554_v33 }
 0x1cf   : > { %v910_v36 = vpack.c.bf16 %v559_v34, %v558_v35 }
 0x1d1   : > { %911 = vmatprep.subr.bf16.mxu0 %v910_v36 }
 0x1d2   : > { %913 = vmatpush3.bf16.msra.mxu0 %v910_v36 }
 0x1d5   : > { %893 = vmatmul.mubr.msk.f32.vlgmr.msra.gmra.mrb[2].mxu0 %vm377_vm0, %v561_v37 }
 0x2a8   : > { %v894_v38 = vpop.f32.mrb[2].mxu0 }
 0x2a9   : > { %v634_v39 = vpop.f32.mrb[3].mxu0 }
 0x2aa   : > { %899 = vmatprep.mubr.msk.f32.mxu1 %vm377_vm0, %v634_v39 }
 0x2ab   : > { %900 = vmatmul.mubr.msk.f32.vlgmr.msra.gmra.mrb[2].mxu1 %vm377_vm0, %v894_v38 }
 0x37e   : > { %v901_v40 = vpop.f32.mrb[2].mxu1 }
 0x37f   : > { %v727_v41 = vmul.f32 0.25, %v901_v40  ;;  %v717_v42 = vpop.f32.mrb[3].mxu1 }
 0x380   : > { %v726_v43 = vmul.f32 0.25, %v717_v42 }
 0x381   : > { %v729_v44 = vadd.f32 128.0, %v727_v41 }
 0x382   : > { %v728_v45 = vadd.f32 128.0, %v726_v43 }
 0x383   : > { %731 = vst.msk [vmem:[%s369_s26 + $0x8] sm:$0xff] %vm377_vm0, %v729_v44 }
 0x384   : > { %730 = vst.msk [vmem:[%s369_s26] sm:$0xff] %vm377_vm0, %v728_v45 }
 0x385 PF: > { %s18_s29 = sadd.s32 1, %s970_s29   ;;  %s1118_s27 = smov %s966_s28 }
 0x386   : > { %p15_p5 = scmp.ge.s32.totalorder %s18_s29, 4   ;;  %s1119_s28 = smov %s1121_s30 }
 0x388   :  { %17 = sbr.rel (!%p15_p5) target bundleno = 2 (0x2), region = 82 }

// kernel: diff_jpeg.4
= control target key start
LH: loop header
LB: loop body
LE: loop exit
PB: predicated region body
PF: predicated region fallthrough
CT: control target
= control target key end

     0   :  { %10 = vsyncpa [#allocation3], 0  ;;  %s1195_s0 = inlined_call_operand.hbm [shape: f32[2,3,16,16], index: 0, kind: input, shape index: {}]   ;;  %s1196_s1 = inlined_call_operand.vmem [shape: f32[8,16], index: 1, kind: input, shape index: {}]   ;;  %s1197_s2 = inlined_call_operand.vmem [shape: f32[16,8], index: 2, kind: input, shape index: {}]   ;;  %s1198_s3 = inlined_call_operand.vmem [shape: f32[2,16,16], index: 3, kind: output, shape index: {0}]   ;;  %s1199_s4 = inlined_call_operand.vmem [shape: f32[2,2,8,8], index: 4, kind: output, shape index: {1}]  }
   0x1   :  { %12 = vsyncpa [#allocation3 + $0x1], 0  ;;  %s1051_s15 = smov 0   ;;  %s1053_s16 = smov 0  }
   0x2   :  { %s1055_s17 = smov 0   ;;  %s1057_s18 = smov 0  }
   0x3   :  { %s1059_s19 = smov 0   ;;  %s1061_s20 = smov 0  }
   0x4 LB: > { %s800_s21 = sadd.s32 4294967295, %s1018_s20   ;;  %s37_s22 = sadd.s32 1, %s1014_s19  ;;  %s1018_s20 = sphi %s1061_s20, %s18_s20   ;;  %s1014_s19 = sphi %s1059_s19, %s1206_s19   ;;  %s1010_s18 = sphi %s1057_s18, %s1205_s18   ;;  %s1006_s17 = sphi %s1055_s17, %s1204_s17   ;;  %s1002_s16 = sphi %s1053_s16, %s1203_s16   ;;  %s998_s15 = sphi %s1051_s15, %s1202_s15  }
   0x5   : > { %p39_p0 = scmp.ge.s32.totalorder %s37_s22, 2  ;;  %s48_s23 = sadd.s32 1, %s1006_s17 }
   0x6   : > { %p55_p1 = scmp.ne.s32.totalorder %s1006_s17, %s1002_s16  ;;  %p56_p2 = scmp.eq.s32.totalorder %s1018_s20, 0 }
   0x7   : > { %s1208_s22 = smov (%p39_p0, %s37_s22), 0  ;;  %p61_p4 = scmp.ne.s32.totalorder %s1002_s16, %s998_s15 }
   0x8   : > { %p57_p3 = por %p56_p2, %p55_p1  ;;  %s41_s24 = ssub.s32 %s1014_s19, %s1208_s22 }
   0x9   : > { %p62_p5 = scmp.eq.s32.totalorder %s800_s21, 0  ;;  %p46_p6 = scmp.eq.s32.totalorder %s41_s24, 0 }
   0xa   : > { %p884_p8 = scmp.lt.s32.totalorder %s1018_s20, 2  ;;  %s193_s27 = sand.u32 1, %s1006_s17  }
   0xb   : > { %p1090_p7 = por %p62_p5, %p61_p4  ;;  %s876_s28 = smul.u32 768, %s1014_s19 }
   0xc   : > { %s1096_s26 = scalar_select %p46_p6, %s1006_s17, %s48_s23  }
   0xd   : > { %s875_s29 = smul.u32 48, %s193_s27  ;;  %s1103_s6 = scalar_lea.hbm %s1195_s0, %s876_s28 }
   0xe   : > { %p1105_p9 = pnand %p884_p8, %p57_p3  ;;  %s1111_s10 = scalar_lea.sflag [#allocation3], %s193_s27 }
   0xf   : > { %s197_s8 = scalar_lea.vmem [#allocation2], %s875_s29  ;;  %s938_s11 = scalar_lea.hbm %s1103_s6, 768 }
  0x10   : > { %s207_s9 = sshll.u32 %s197_s8, 4  ;;  %p939_p10 = scmp.ne.s32.totalorder %s1103_s6, %s938_s11  ;;  %s1109_s9 = int_to_ptr.vmem [resolvable:$true] %s207_s9 }
  0x11   : > { %p940_p11 = pneg %p1105_p9  ;;  %s943_s14 = scalar_lea.hbm %s1195_s0, 1536 }
  0x12   : > { %p944_p0 = scmp.lt.u32.totalorder %s1103_s6, %s1195_s0  ;;  %p945_p1 = scmp.lt.u32.totalorder %s943_s14, %s938_s11 }
  0x13   : > { %p941_p12 = pnand %p940_p11, %p939_p10  ;;  %p947_p3 = scmp.lt.u32.totalorder %s938_s11, %s1103_s6 }
  0x14   : > { %p946_p2 = por %p945_p1, %p944_p0 }
  0x15   : > { %p942_p13 = pneg %p941_p12 }
  0x16   : > { %p948_p4 = por %p947_p3, %p946_p2 }
  0x18   : > { %p949_p5 = pnand %p948_p4, %p942_p13 }
  0x1a   : > { %952 = shalt.err (!%p949_p5)
}
  0x1b   : > { %s953_s23 = scalar_lea.vmem %s1109_s9, 768  ;;  %s1020_s24 = smov [#allocation2]  }
  0x1c   : > { %p954_p6 = scmp.ne.s32.totalorder %s1109_s9, %s953_s23  ;;  %s958_s27 = sshll.u32 %s1020_s24, 4  ;;  %s959_s27 = int_to_ptr.vmem [resolvable:$false] %s958_s27 }
  0x1d   : > { %s960_s28 = scalar_lea.vmem %s959_s27, 1536  ;;  %p961_p12 = scmp.lt.s32.totalorder %s1109_s9, %s959_s27 }
  0x1e   : > { %p956_p8 = pnand %p954_p6, %p940_p11  ;;  %p962_p0 = scmp.lt.s32.totalorder %s960_s28, %s953_s23 }
  0x20   : > { %p957_p10 = pneg %p956_p8  ;;  %p963_p1 = por %p962_p0, %p961_p12 }
  0x22   : > { %p964_p2 = pnand %p963_p1, %p957_p10 }
  0x24   : > { %967 = shalt.err (!%p964_p2)
}
  0x25   : > { %s1021_s29 = smov 128   ;;  %s1022_s30 = smov 8  }
  0x26   : > { %883 = dma.hbm_to_vmem [thread:$0]  (!%p1105_p9), %s1103_s6, 768, %s1109_s9, %s1111_s10, %s1021_s29, %s1021_s29, %s1022_s30  }
  0x27   : > { %p805_p11 = scmp.ge.s32.totalorder %s1018_s20, 1  ;;  %p215_p13 = scmp.lt.s32.totalorder %s1018_s20, 3 }
  0x29   : > { %p216_p3 = pnand %p805_p11, %p215_p13 }
  0x2a   : > { %s221_s5 = sand.u32 (!%p216_p3), 1, %s1002_s16  }
  0x2b   : > { %219 = sbr.rel (%p216_p3) target bundleno = 498 (0x1f2), region = 32  ;;  %s222_s11 = scalar_lea.sflag (!%p216_p3), [#allocation3], %s221_s5 }
  0x2c   : > { %s877_s8 = smul.u32 (!%p216_p3), 48, %s221_s5 }
  0x2e   : > { %s225_s12 = scalar_lea.vmem (!%p216_p3), [#allocation2], %s877_s8 }
  0x32   : > { %993 = dma.done.wait (%p1090_p7), %s222_s11, 768  }
  0x33   : > { %995 = vsyncadd (%p1090_p7), %s222_s11, 4294966528  ;;  %v1023_v0 = vmov 0.0|0.0   ;;  %vm1024_vm0 = vmmov 0   ;;  %v1025_v1 = vmov 0.0   ;;  %v293_v2 = vld [vmem:[%s225_s12] sm:$0xff]  ;;  %v294_v3 = vld [vmem:[%s225_s12 + $0x8] sm:$0xff] }
  0x34   : > { %863 = vmatprep.subr.bf16.mxu0 %v1023_v0  ;;  %839 = vmatprep.mubr.msk.f32.mxu0 %vm1024_vm0, %v1025_v1  ;;  %v810_v4 = vld [vmem:[%s225_s12 + $0x10] sm:$0xff]  ;;  %v811_v5 = vld [vmem:[%s225_s12 + $0x18] sm:$0xff]  ;;  %v812_v6 = vld [vmem:[%s225_s12 + $0x20] sm:$0xff]  ;;  %v301_v8 = vmul.f32 0.299, %v293_v2  ;;  %v326_v9 = vmul.f32 0.5, %v293_v2 }
  0x35   : > { %866 = vmatprep.subr.bf16.mxu1 %v1023_v0  ;;  %846 = vmatprep.mubr.msk.f32.mxu1 %vm1024_vm0, %v1025_v1  ;;  %v813_v7 = vld [vmem:[%s225_s12 + $0x28] sm:$0xff]  ;;  %v302_v10 = vmul.f32 0.299, %v294_v3  ;;  %v303_v11 = vmul.f32 0.587, %v810_v4  ;;  %v339_v20 = vld [vmem:[%s1197_s2] sm:$0xff] }
  0x36   : > { %v304_v12 = vmul.f32 0.587, %v811_v5  ;;  %v307_v13 = vmul.f32 0.114, %v812_v6  ;;  %v308_v14 = vmul.f32 0.114, %v813_v7 }
  0x37   : > { %v314_v15 = vmul.f32 -0.168736, %v293_v2  ;;  %v305_v16 = vadd.f32 %v303_v11, %v301_v8  ;;  %v315_v18 = vmul.f32 -0.168736, %v294_v3  ;;  %v316_v19 = vmul.f32 0.331264, %v810_v4 }
  0x38   : > { %v306_v17 = vadd.f32 %v304_v12, %v302_v10  ;;  %v317_v21 = vmul.f32 0.331264, %v811_v5  ;;  %v320_v22 = vmul.f32 0.5, %v812_v6  ;;  %v321_v23 = vmul.f32 0.5, %v813_v7  ;;  %v340_v25 = vld [vmem:[%s1197_s2 + $0x8] sm:$0xff]  ;;  %v338_v46 = vld [vmem:[%s1196_s1] sm:$0xff] }
  0x39   : > { %v327_v24 = vmul.f32 0.5, %v294_v3  ;;  %v309_v26 = vadd.f32 %v307_v13, %v305_v16  ;;  %v318_v28 = vsub.f32 %v314_v15, %v316_v19  ;;  %v328_v29 = vmul.f32 0.418688, %v810_v4  ;;  %p270_p7 = scmp.lt.s32.totalorder %s1010_s18, 1 }
  0x3a   : > { %v310_v27 = vadd.f32 %v308_v14, %v306_v17  ;;  %v319_v30 = vsub.f32 %v315_v18, %v317_v21  ;;  %v329_v31 = vmul.f32 0.418688, %v811_v5  ;;  %v332_v32 = vmul.f32 0.081312, %v812_v6 }
  0x3b   : > { %v333_v33 = vmul.f32 0.081312, %v813_v7  ;;  %v322_v34 = vadd.f32 %v320_v22, %v318_v28  ;;  %v330_v35 = vsub.f32 %v326_v9, %v328_v29  ;;  %v867_v36 = vpack.c.bf16 %v340_v25, %v339_v20  ;;  %s1210_s18 = smov (!%p270_p7, %s1010_s18), 1 }
  0x3c   : > { %v323_v37 = vadd.f32 %v321_v23, %v319_v30  ;;  %v331_v38 = vsub.f32 %v327_v24, %v329_v31  ;;  %vm311_vm1 = vcmask 130048   ;;  %s821_s14 = sshll.u32 %s1210_s18, 4  ;;  %vm487_vm2 = vcmask 64512  }
  0x3d   : > { %v324_v39 = vadd.f32 128.0, %v322_v34  ;;  %v334_v40 = vsub.f32 %v330_v35, %v332_v32  ;;  %868 = vmatpush3.bf16.msra.mxu1 %v867_v36  ;;  %s280_s23 = scalar_lea.vmem %s1198_s3, %s821_s14  ;;  %s292_s27 = scalar_lea.vmem %s1199_s4, %s821_s14 }
  0x3e   : > { %v325_v41 = vadd.f32 128.0, %v323_v37  ;;  %v335_v42 = vsub.f32 %v331_v38, %v333_v33  ;;  %872 = vmatprep.subr.bf16.mxu1 %v1023_v0  ;;  %312 = vst.msk [vmem:[%s280_s23] sm:$0xff] %vm311_vm1, %v309_v26  ;;  %313 = vst.msk [vmem:[%s280_s23 + $0x8] sm:$0xff] %vm311_vm1, %v310_v27 }
  0x3f   : > { %v336_v43 = vadd.f32 128.0, %v334_v40 }
  0x40   : > { %v864_v44 = vpack.c.bf16 %v325_v41, %v324_v39  ;;  %v337_v45 = vadd.f32 128.0, %v335_v42 }
  0x42   : > { %865 = vmatpush3.bf16.msra.mxu0 %v864_v44  ;;  %v870_v47 = vpack.c.bf16 %v337_v45, %v336_v43 }
  0x43   : > { %869 = vmatprep.subr.bf16.mxu0 %v1023_v0 }
  0x45   : > { %840 = vmatmul.mubr.msk.f32.vlgmr.msra.gmra.mrb[0].mxu0 %vm311_vm1, %v338_v46 }
  0x46   : > { %871 = vmatpush3.bf16.msra.mxu0 %v870_v47  ;;  %853 = vmatprep.mubr.msk.f32.mxu0 %vm1024_vm0, %v1025_v1 }
  0x49   : > { %854 = vmatmul.mubr.msk.f32.vlgmr.msra.gmra.mrb[2].mxu0 %vm311_vm1, %v338_v46 }
 0x118   : > { %v410_v48 = vpop.f32.mrb[0].mxu0 }
 0x119   : > { %v841_v49 = vpop.f32.mrb[1].mxu0  ;;  %847 = vmatmul.mubr.msk.f32.vlgmr.msra.gmra.mrb[0].mxu1 %vm311_vm1, %v410_v48 }
 0x11a   : > { %874 = vmatpush3.bf16.msra.mxu1 %v867_v36  ;;  %860 = vmatprep.mubr.msk.f32.mxu1 %vm1024_vm0, %v1025_v1 }
 0x11c   : > { %v555_v50 = vpop.f32.mrb[2].mxu0 }
 0x11d   : > { %v855_v51 = vpop.f32.mrb[3].mxu0  ;;  %861 = vmatmul.mubr.msk.f32.vlgmr.msra.gmra.mrb[2].mxu1 %vm311_vm1, %v555_v50 }
 0x1ec   : > { %v483_v52 = vpop.f32.mrb[0].mxu1 }
 0x1ed   : > { %488 = vst.msk [vmem:[%s292_s27] sm:$0xff] %vm487_vm2, %v483_v52  ;;  %v848_v53 = vpop.f32.mrb[1].mxu1 }
 0x1f0   : > { %v628_v54 = vpop.f32.mrb[2].mxu1 }
 0x1f1   : > { %818 = vst.msk [vmem:[%s292_s27 + $0x8] sm:$0xff] %vm487_vm2, %v628_v54  ;;  %v862_v55 = vpop.f32.mrb[3].mxu1 }
 0x1f2 PF: > { %s18_s20 = sadd.s32 1, %s1018_s20   ;;  %s1202_s15 = smov %s1002_s16 }
 0x1f3   : > { %p15_p9 = scmp.ge.s32.totalorder %s18_s20, 4   ;;  %s1203_s16 = smov %s1006_s17 }
 0x1f4   : > { %s1204_s17 = smov %s1096_s26  ;;  %s1205_s18 = smov %s1014_s19 }
 0x1f5   : > { %s1206_s19 = smov %s1208_s22  ;;  %17 = sbr.rel (!%p15_p9) target bundleno = 4 (0x4), region = 87 }
 0x1fc   :  { %698 = vsyncpa [#allocation3], 1 }
 0x1fd   :  { %700 = vsyncpa [#allocation3 + $0x1], 1 }

// kernel: diff_jpeg.7
= control target key start
LH: loop header
LB: loop body
LE: loop exit
PB: predicated region body
PF: predicated region fallthrough
CT: control target
= control target key end

     0   :  { %9 = vsyncpa [#allocation3], 0  ;;  %s1156_s0 = inlined_call_operand.vmem [shape: f32[2,16,16], index: 0, kind: input, shape index: {}]   ;;  %s1157_s1 = inlined_call_operand.vmem [shape: f32[2,2,8,8], index: 1, kind: input, shape index: {}]   ;;  %s1158_s2 = inlined_call_operand.vmem [shape: f32[16,8], index: 2, kind: input, shape index: {}]   ;;  %s1159_s3 = inlined_call_operand.vmem [shape: f32[8,16], index: 3, kind: input, shape index: {}]   ;;  %s1160_s4 = inlined_call_operand.hbm [shape: f32[2,3,16,16], index: 4, kind: output, shape index: {}]  }
   0x1   :  { %11 = vsyncpa [#allocation3 + $0x1], 0  ;;  %s1011_s15 = smov 0   ;;  %s1013_s16 = smov 0  }
   0x2   :  { %s1015_s17 = smov 0   ;;  %s1017_s18 = smov 0  }
   0x3   :  { %s1019_s19 = smov 0   ;;  %s1021_s20 = smov 0  }
   0x4 LB: > { %s781_s21 = sadd.s32 4294967295, %s981_s20   ;;  %s782_s22 = sadd.s32 4294967294, %s981_s20   ;;  %s981_s20 = sphi %s1021_s20, %s17_s20   ;;  %s977_s19 = sphi %s1019_s19, %s1167_s19   ;;  %s973_s18 = sphi %s1017_s18, %s1166_s18   ;;  %s969_s17 = sphi %s1015_s17, %s1165_s17   ;;  %s965_s16 = sphi %s1013_s16, %s1164_s16   ;;  %s961_s15 = sphi %s1011_s15, %s1163_s15  }
   0x5   : > { %s36_s23 = sadd.s32 1, %s977_s19  ;;  %s149_s24 = sadd.s32 1, %s969_s17 }
   0x6   : > { %p38_p0 = scmp.ge.s32.totalorder %s36_s23, 2  ;;  %p159_p1 = scmp.ne.s32.totalorder %s969_s17, %s965_s16 }
   0x7   : > { %p160_p2 = scmp.eq.s32.totalorder %s781_s21, 1  ;;  %p165_p3 = scmp.ne.s32.totalorder %s965_s16, %s961_s15 }
   0x8   : > { %s1169_s23 = smov (%p38_p0, %s36_s23), 0  ;;  %p166_p5 = scmp.eq.s32.totalorder %s782_s22, 1 }
   0x9   : > { %p1051_p4 = por %p160_p2, %p159_p1  ;;  %s142_s26 = ssub.s32 %s977_s19, %s1169_s23 }
   0xa   : > { %p785_p6 = scmp.ge.s32.totalorder %s981_s20, 1  ;;  %p147_p7 = scmp.eq.s32.totalorder %s142_s26, 0 }
   0xb   : > { %p1058_p8 = por %p166_p5, %p165_p3  ;;  %p220_p9 = scmp.lt.s32.totalorder %s981_s20, 3 }
   0xc   : > { %s1064_s28 = scalar_select %p147_p7, %s969_s17, %s149_s24  }
   0xd   : > { %p221_p10 = pnand %p785_p6, %p220_p9 }
   0xe   : > { %p265_p11 = scmp.lt.s32.totalorder (!%p221_p10), %s973_s18, 1  ;;  %v291_v0 = vld [vmem:[%s1158_s2] sm:$0xff] (!%p221_p10)  ;;  %vm295_vm0 = vcmask (!%p221_p10), 64512   ;;  %v292_v2 = vld [vmem:[%s1158_s2 + $0x8] sm:$0xff] (!%p221_p10)  ;;  %s261_s24 = sand.u32 (!%p221_p10), 1, %s965_s16   ;;  %vm640_vm1 = vcmask (!%p221_p10), 130048  }
   0xf   : > { %224 = sbr.rel (%p221_p10) target bundleno = 485 (0x1e5), region = 36  ;;  %826 = vmatprep.mubr.msk.f32.mxu0 (!%p221_p10), %vm295_vm0, %v291_v0  ;;  %v293_v4 = vld [vmem:[%s1159_s3] sm:$0xff] (!%p221_p10)  ;;  %s1110_s8 = scalar_lea.sflag (!%p221_p10), [#allocation3], %s261_s24 }
  0x10   : > { %829 = vmatprep.subr.mxu1 (!%p221_p10), %v293_v4  ;;  %s844_s26 = smul.u32 (!%p221_p10), 48, %s261_s24  ;;  %s983_s10 = smov (!%p221_p10), [#allocation2]  }
  0x11   : > { %830 = vmatpush3.msra.mxu1 (!%p221_p10), %v293_v4  ;;  %s845_s29 = smul.u32 (!%p221_p10), 768, %s973_s18  ;;  %s907_s11 = sshll.u32 (!%p221_p10), %s983_s10, 4  ;;  %s908_s11 = int_to_ptr.vmem [resolvable:$false] %s907_s11 }
  0x12   : > { %839 = vmatprep.subr.mxu1 (!%p221_p10), %v293_v4  ;;  %s263_s30 = scalar_lea.vmem (!%p221_p10), [#allocation2], %s844_s26  ;;  %s909_s12 = scalar_lea.vmem (!%p221_p10), %s908_s11, 1536 }
  0x16   : > { %s266_s5 = scalar_select %p265_p11, %s973_s18, 1 }
  0x17   : > { %s1100_s18 = scalar_lea.hbm %s1160_s4, %s845_s29 }
  0x18   : > { %s810_s6 = sshll.u32 %s266_s5, 4  ;;  %s674_s5 = sshll.u32 %s263_s30, 4  ;;  %s1102_s5 = int_to_ptr.vmem [resolvable:$true] %s674_s5 }
  0x19   : > { %s287_s9 = scalar_lea.vmem %s1157_s1, %s810_s6  ;;  %s275_s22 = scalar_lea.vmem %s1156_s0, %s810_s6 }
  0x1a   : > { %v294_v1 = vld [vmem:[%s287_s9] sm:$0xff]  ;;  %v796_v3 = vld [vmem:[%s287_s9 + $0x8] sm:$0xff]  ;;  %s903_s9 = scalar_lea.vmem %s1102_s5, 768  ;;  %p910_p1 = scmp.lt.s32.totalorder %s1102_s5, %s908_s11 }
  0x1b   : > { %824 = vmatprep.subr.mxu0 %v294_v1  ;;  %v290_v12 = vld [vmem:[%s275_s22 + $0x8] sm:$0xff]  ;;  %v289_v14 = vld [vmem:[%s275_s22] sm:$0xff]  ;;  %p904_p12 = scmp.ne.s32.totalorder %s1102_s5, %s903_s9  ;;  %p911_p2 = scmp.lt.s32.totalorder %s909_s12, %s903_s9 }
  0x1c   : > { %825 = vmatpush3.msra.mxu0 %v294_v1 }
  0x1d   : > { %827 = vmatmul.mubr.msk.f32.vlgmr.msra.gmra.mrb[0].mxu0 %vm295_vm0, %v292_v2  ;;  %834 = vmatprep.subr.mxu0 %v796_v3  ;;  %p905_p13 = pnand %p904_p12, %p1051_p4  ;;  %p912_p3 = por %p911_p2, %p910_p1 }
  0x1e   : > { %835 = vmatpush3.msra.mxu0 %v796_v3  ;;  %836 = vmatprep.mubr.msk.f32.mxu0 %vm295_vm0, %v291_v0 }
  0x1f   : > { %p906_p0 = pneg %p905_p13 }
  0x21   : > { %837 = vmatmul.mubr.msk.f32.vlgmr.msra.gmra.mrb[2].mxu0 %vm295_vm0, %v292_v2  ;;  %p913_p5 = pnand %p912_p3, %p906_p0 }
  0xf0   : > { %v828_v5 = vpop.f32.mrb[0].mxu0 }
  0xf1   : > { %v368_v6 = vpop.f32.mrb[1].mxu0 }
  0xf2   : > { %831 = vmatprep.mubr.msk.f32.mxu1 %vm295_vm0, %v368_v6 }
  0xf3   : > { %832 = vmatmul.mubr.msk.f32.vlgmr.msra.gmra.mrb[0].mxu1 %vm295_vm0, %v828_v5 }
  0xf4   : > { %v838_v7 = vpop.f32.mrb[2].mxu0  ;;  %840 = vmatpush3.msra.mxu1 %v293_v4 }
  0xf5   : > { %v528_v8 = vpop.f32.mrb[3].mxu0 }
  0xf6   : > { %841 = vmatprep.mubr.msk.f32.mxu1 %vm295_vm0, %v528_v8 }
  0xf7   : > { %842 = vmatmul.mubr.msk.f32.vlgmr.msra.gmra.mrb[2].mxu1 %vm295_vm0, %v838_v7 }
 0x1c6   : > { %v833_v9 = vpop.f32.mrb[0].mxu1 }
 0x1c7   : > { %v795_v10 = vadd.f32 -128.0, %v833_v9  ;;  %v449_v11 = vpop.f32.mrb[1].mxu1 }
 0x1c8   : > { %v794_v13 = vadd.f32 -128.0, %v449_v11 }
 0x1c9   : > { %v625_v15 = vmul.f32 0.344136, %v795_v10  ;;  %v633_v16 = vmul.f32 1.772, %v795_v10 }
 0x1ca   : > { %v624_v17 = vmul.f32 0.344136, %v794_v13  ;;  %v632_v18 = vmul.f32 1.772, %v794_v13  ;;  %v843_v19 = vpop.f32.mrb[2].mxu1 }
 0x1cb   : > { %v627_v20 = vsub.f32 %v290_v12, %v625_v15  ;;  %v635_v21 = vadd.f32 %v633_v16, %v290_v12  ;;  %v802_v22 = vadd.f32 -128.0, %v843_v19  ;;  %v609_v23 = vpop.f32.mrb[3].mxu1 }
 0x1cc   : > { %v626_v24 = vsub.f32 %v289_v14, %v624_v17  ;;  %v634_v25 = vadd.f32 %v632_v18, %v289_v14  ;;  %v801_v26 = vadd.f32 -128.0, %v609_v23 }
 0x1cd   : > { %v651_v27 = vmax.f32 %v635_v21, 0.0  ;;  %v621_v28 = vmul.f32 1.402, %v802_v22  ;;  %v629_v29 = vmul.f32 0.714136, %v802_v22 }
 0x1ce   : > { %v650_v30 = vmax.f32 %v634_v25, 0.0  ;;  %v620_v31 = vmul.f32 1.402, %v801_v26  ;;  %v628_v32 = vmul.f32 0.714136, %v801_v26 }
 0x1cf   : > { %v653_v33 = vmin.f32 %v651_v27, 255.0  ;;  %v623_v34 = vadd.f32 %v621_v28, %v290_v12  ;;  %v631_v35 = vsub.f32 %v627_v20, %v629_v29 }
 0x1d0   : > { %v652_v36 = vmin.f32 %v650_v30, 255.0  ;;  %v622_v37 = vadd.f32 %v620_v31, %v289_v14  ;;  %v630_v38 = vsub.f32 %v626_v24, %v628_v32 }
 0x1d1   : > { %806 = vst.msk [vmem:[%s263_s30 + $0x28] sm:$0xff] %vm640_vm1, %v653_v33  ;;  %v637_v39 = vmax.f32 %v623_v34, 0.0  ;;  %v644_v40 = vmax.f32 %v631_v35, 0.0 }
 0x1d2   : > { %805 = vst.msk [vmem:[%s263_s30 + $0x20] sm:$0xff] %vm640_vm1, %v652_v36  ;;  %v636_v41 = vmax.f32 %v622_v37, 0.0  ;;  %v643_v42 = vmax.f32 %v630_v38, 0.0 }
 0x1d3   : > { %v639_v43 = vmin.f32 %v637_v39, 255.0  ;;  %v646_v44 = vmin.f32 %v644_v40, 255.0 }
 0x1d4   : > { %v638_v45 = vmin.f32 %v636_v41, 255.0  ;;  %v645_v46 = vmin.f32 %v643_v42, 255.0 }
 0x1d5   : > { %642 = vst.msk [vmem:[%s263_s30 + $0x8] sm:$0xff] %vm640_vm1, %v639_v43  ;;  %804 = vst.msk [vmem:[%s263_s30 + $0x18] sm:$0xff] %vm640_vm1, %v646_v44 }
 0x1d6   : > { %641 = vst.msk [vmem:[%s263_s30] sm:$0xff] %vm640_vm1, %v638_v45  ;;  %803 = vst.msk [vmem:[%s263_s30 + $0x10] sm:$0xff] %vm640_vm1, %v645_v46 }
 0x1d7   : > { %916 = shalt.err (!%p913_p5)
}
 0x1d8   : > { %s917_s13 = scalar_lea.hbm %s1100_s18, 768  ;;  %s921_s22 = scalar_lea.hbm %s1160_s4, 1536 }
 0x1d9   : > { %p918_p6 = scmp.ne.s32.totalorder %s1100_s18, %s917_s13  ;;  %p922_p10 = scmp.lt.u32.totalorder %s1100_s18, %s1160_s4 }
 0x1da   : > { %p923_p11 = scmp.lt.u32.totalorder %s921_s22, %s917_s13  ;;  %p925_p13 = scmp.lt.u32.totalorder %s917_s13, %s1100_s18 }
 0x1db   : > { %p919_p7 = pnand %p918_p6, %p1051_p4 }
 0x1dc   : > { %p924_p12 = por %p923_p11, %p922_p10 }
 0x1dd   : > { %p920_p9 = pneg %p919_p7 }
 0x1de   : > { %p926_p0 = por %p925_p13, %p924_p12 }
 0x1e0   : > { %p927_p1 = pnand %p926_p0, %p920_p9 }
 0x1e2   : > { %930 = shalt.err (!%p927_p1)
}
 0x1e3   : > { %s984_s29 = smov 128   ;;  %s985_s30 = smov 8  }
 0x1e4   : > { %846 = dma.vmem_to_hbm [thread:$0]  (%p1051_p4), %s1102_s5, 768, %s1100_s18, %s1110_s8, %s984_s29, %s984_s29, %s985_s30  }
 0x1e5 PF: > { %p852_p2 = scmp.ge.s32.totalorder %s981_s20, 2  ;;  %s689_s6 = sand.u32 1, %s961_s15  }
 0x1e6   : > { %s690_s7 = scalar_lea.sflag [#allocation3], %s689_s6 }
 0x1e7   : > { %p849_p3 = pnand %p852_p2, %p1058_p8 }
 0x1e9   : > { %956 = dma.done.wait (!%p849_p3), %s690_s7, 768  }
 0x1ea   : > { %958 = vsyncadd (!%p849_p3), %s690_s7, 4294966528  ;;  %s17_s20 = sadd.s32 1, %s981_s20   ;;  %s1163_s15 = smov %s965_s16 }
 0x1eb   : > { %p14_p5 = scmp.ge.s32.totalorder %s17_s20, 4   ;;  %s1164_s16 = smov %s969_s17 }
 0x1ec   : > { %s1165_s17 = smov %s1064_s28  ;;  %s1166_s18 = smov %s977_s19 }
 0x1ed   : > { %s1167_s19 = smov %s1169_s23  ;;  %16 = sbr.rel (!%p14_p5) target bundleno = 4 (0x4), region = 77 }
 0x1f4   :  { %695 = vsyncpa [#allocation3], 1 }
 0x1f5   :  { %697 = vsyncpa [#allocation3 + $0x1], 1 }

// kernel: diff_jpeg.6
= control target key start
LH: loop header
LB: loop body
LE: loop exit
PB: predicated region body
PF: predicated region fallthrough
CT: control target
= control target key end

     0   :  { %s901_s27 = smov 0   ;;  %s903_s28 = smov 0   ;;  %s971_s0 = inlined_call_operand.vmem [shape: f32[4,8,8], index: 0, kind: input, shape index: {}]   ;;  %s972_s1 = inlined_call_operand.vmem [shape: f32[8,8], index: 1, kind: input, shape index: {}, may-alias: {1,4}]   ;;  %s973_s2 = inlined_call_operand.vmem [shape: f32[8,8], index: 2, kind: input, shape index: {}, may-alias: {2,3}]   ;;  %s974_s3 = inlined_call_operand.vmem [shape: f32[8,8], index: 3, kind: input, shape index: {}, may-alias: {2,3}]   ;;  %s975_s4 = inlined_call_operand.vmem [shape: f32[8,8], index: 4, kind: input, shape index: {}, may-alias: {1,4}]   ;;  %s976_s5 = inlined_call_operand.vmem [shape: f32[8,8], index: 5, kind: input, shape index: {}]   ;;  %s977_s6 = inlined_call_operand.vmem [shape: f32[8,8], index: 6, kind: input, shape index: {}]   ;;  %s978_s7 = inlined_call_operand.vmem [shape: f32[8,8], index: 7, kind: input, shape index: {}]   ;;  %s979_s8 = inlined_call_operand.vmem [shape: f32[4,8,8], index: 8, kind: output, shape index: {}]  }
   0x1   :  { %s905_s29 = smov 0  }
   0x2 LB: > { %s37_s30 = sadd.s32 1, %s848_s28  ;;  %p763_p0 = scmp.ge.s32.totalorder %s852_s29, 1  ;;  %s852_s29 = sphi %s905_s29, %s18_s29   ;;  %s848_s28 = sphi %s903_s28, %s981_s28   ;;  %s844_s27 = sphi %s901_s27, %s980_s27  }
   0x3   : > { %p39_p1 = scmp.ge.s32.totalorder %s37_s30, 4  ;;  %p294_p2 = scmp.lt.s32.totalorder %s852_s29, 5 }
   0x5   : > { %s983_s30 = smov (%p39_p1, %s37_s30), 0  ;;  %p295_p3 = pnand %p763_p0, %p294_p2 }
   0x6   : > { %p338_p4 = scmp.lt.s32.totalorder (!%p295_p3), %s844_s27, 3  ;;  %v854_v0 = vmov (!%p295_p3), 0.0   ;;  %vm855_vm0 = vmmov (!%p295_p3), 0   ;;  %v360_v3 = vld [vmem:[%s972_s1] sm:$0xff] (!%p295_p3)  ;;  %vm361_vm1 = vcmask (!%p295_p3), 64512  }
   0x7   : > { %298 = sbr.rel (%p295_p3) target bundleno = 885 (0x375), region = 52  ;;  %781 = vmatprep.subr.mxu0 (!%p295_p3), %v854_v0  ;;  %783 = vmatprep.mubr.msk.f32.mxu0 (!%p295_p3), %vm855_vm0, %v854_v0  ;;  %v435_v4 = vld [vmem:[%s973_s2] sm:$0xff] (!%p295_p3) }
   0x8   : > { %786 = vmatprep.subr.mxu1 (!%p295_p3), %v854_v0  ;;  %788 = vmatprep.mubr.msk.f32.mxu1 (!%p295_p3), %vm855_vm0, %v854_v0  ;;  %v592_v7 = vld [vmem:[%s975_s4] sm:$0xff] (!%p295_p3) }
   0x9   : > { %787 = vmatpush3.msra.mxu1 (!%p295_p3), %v435_v4  ;;  %v511_v8 = vld [vmem:[%s978_s7] sm:$0xff] (!%p295_p3) }
   0xa   : > { %796 = vmatprep.subr.mxu1 (!%p295_p3), %v854_v0  ;;  %828 = vrcp.f32 (!%p295_p3), %v511_v8  ;;  %v509_v9 = vld [vmem:[%s976_s5] sm:$0xff] (!%p295_p3) }
   0xb   : > { %v516_v16 = vld [vmem:[%s977_s6] sm:$0xff] (!%p295_p3) }
   0xc   : > { %v518_v19 = vld [vmem:[%s974_s3] sm:$0xff] (!%p295_p3) }
   0xe   : > { %s985_s27 = smov (!%p338_p4, %s844_s27), 3 }
   0xf   : > { %s764_s9 = sshll.u32 %s985_s27, 3 }
  0x10   : > { %s347_s12 = scalar_lea.vmem %s971_s0, %s764_s9 }
  0x11   : > { %v358_v1 = vld [vmem:[%s347_s12] sm:$0xff]  ;;  %s357_s12 = scalar_lea.vmem %s979_s8, %s764_s9 }
  0x12   : > { %v766_v2 = vadd.f32 -128.0, %v358_v1 }
  0x14   : > { %782 = vmatpush3.msra.mxu0 %v766_v2  ;;  %v829_v10 = vpop.eup %828 }
  0x15   : > { %784 = vmatmul.mubr.msk.f32.vlgmr.msra.gmra.mrb[0].mxu0 %vm361_vm1, %v360_v3  ;;  %791 = vmatprep.subr.mxu0 %v854_v0 }
  0x16   : > { %793 = vmatprep.mubr.msk.f32.mxu0 %vm855_vm0, %v854_v0 }
  0xe8   : > { %v431_v5 = vpop.f32.mrb[0].mxu0 }
  0xe9   : > { %v785_v6 = vpop.f32.mrb[1].mxu0  ;;  %789 = vmatmul.mubr.msk.f32.vlgmr.msra.gmra.mrb[0].mxu1 %vm361_vm1, %v431_v5 }
  0xea   : > { %798 = vmatprep.mubr.msk.f32.mxu1 %vm855_vm0, %v854_v0  ;;  %797 = vmatpush3.msra.mxu1 %v592_v7 }
 0x1bc   : > { %v505_v11 = vpop.f32.mrb[0].mxu1 }
 0x1bd   : > { %v510_v12 = vmul.f32 %v509_v9, %v505_v11  ;;  %v790_v13 = vpop.f32.mrb[1].mxu1 }
 0x1bf   : > { %v513_v14 = vmul.f32 %v829_v10, %v510_v12 }
 0x1c1   : > { %v801_v15 = vround.rtne.f32 %v513_v14 }
 0x1c3   : > { %v515_v17 = vmul.f32 %v801_v15, %v511_v8 }
 0x1c5   : > { %v517_v18 = vmul.f32 %v516_v16, %v515_v17 }
 0x1c7   : > { %792 = vmatpush3.msra.mxu0 %v517_v18 }
 0x1c8   : > { %794 = vmatmul.mubr.msk.f32.vlgmr.msra.gmra.mrb[2].mxu0 %vm361_vm1, %v518_v19 }
 0x29b   : > { %v588_v20 = vpop.f32.mrb[2].mxu0 }
 0x29c   : > { %v795_v21 = vpop.f32.mrb[3].mxu0  ;;  %799 = vmatmul.mubr.msk.f32.vlgmr.msra.gmra.mrb[2].mxu1 %vm361_vm1, %v588_v20 }
 0x36f   : > { %v662_v22 = vpop.f32.mrb[2].mxu1 }
 0x370   : > { %v666_v23 = vmul.f32 0.25, %v662_v22  ;;  %v800_v24 = vpop.f32.mrb[3].mxu1 }
 0x372   : > { %v667_v25 = vadd.f32 128.0, %v666_v23 }
 0x374   : > { %668 = vst.msk [vmem:[%s357_s12] sm:$0xff] %vm361_vm1, %v667_v25 }
 0x375 PF: > { %s18_s29 = sadd.s32 1, %s852_s29   ;;  %s980_s27 = smov %s848_s28 }
 0x376   : > { %p15_p5 = scmp.ge.s32.totalorder %s18_s29, 6   ;;  %s981_s28 = smov %s983_s30 }
 0x378   :  { %17 = sbr.rel (!%p15_p5) target bundleno = 2 (0x2), region = 82 }

</bundles_post_ra>
